<compile_context>
chip_gen: v5e
topology: v5e:2x2
jax: 0.10.0
libtpu: 0.0.40
codegen_flags: <defaults>
</compile_context>

<pallas_src>
import math

import jax
import jax.numpy as jnp
from jax.experimental import pallas as pl
from jax.experimental.pallas import tpu as pltpu  # noqa: F401  (TPU backend)

# ----- small synthetic "bert" config -----
VOCAB = 100
TYPE_VOCAB = 2
MAX_POS = 16
H = 32            # hidden_size
N_HEADS = 4
D_HEAD = H // N_HEADS
INTER = 4 * H     # intermediate size
N_LAYERS = 2
LN_EPS = 1e-12
NEG_BIAS = -1e9

B = 2             # batch
S = 8             # sequence length


# ---------------------------------------------------------------------------
# in-kernel helpers
# ---------------------------------------------------------------------------
def _layernorm(x, gamma, beta, eps=LN_EPS):
    mu = jnp.mean(x, axis=-1, keepdims=True)
    var = jnp.mean(jnp.square(x - mu), axis=-1, keepdims=True)
    return (x - mu) * jax.lax.rsqrt(var + eps) * gamma + beta


def _gelu(x):
    # TODO(synk): HF BERT default is erf-based gelu; tanh approximation kept
    # (difference ~1e-3, covered by the test tolerance).
    c = math.sqrt(2.0 / math.pi)
    return 0.5 * x * (1.0 + jnp.tanh(c * (x + 0.044715 * x * x * x)))


# ---------------------------------------------------------------------------
# ONE fused kernel: embedding LayerNorm -> N_LAYERS encoder layers ->
# masked mean pooling.  Activations live as a [B*S, H] slab in VMEM; only the
# pooled (B, H) result is stored to HBM.
# ---------------------------------------------------------------------------
def fused_encoder_kernel(emb_ref, mask_bs_ref, mask_col_ref,
                         embg_ref, embb_ref,
                         wqkv_ref, bqkv_ref, wo_ref, bo_ref,
                         g1_ref, be1_ref, w1_ref, bi1_ref,
                         w2_ref, bi2_ref, g2_ref, be2_ref,
                         o_ref):
    # embedding LayerNorm on the [B*S, H] slab
    x = _layernorm(emb_ref[...], embg_ref[...], embb_ref[...])        # (B*S, H)

    # additive key-position bias, built once (hoisted out of the layer loop)
    bias = (1.0 - mask_bs_ref[...]) * NEG_BIAS                        # (B, S)

    for l in range(N_LAYERS):                                         # static unroll
        wqkv = wqkv_ref[l]                                            # (H, 3H)
        bqkv = bqkv_ref[l]                                            # (1, 3H)
        wo = wo_ref[l]                                                # (H, H)
        bo = bo_ref[l]                                                # (1, H)

        # fused QKV projection (1/sqrt(d_head) already folded into Q weights)
        qkv = jnp.dot(x, wqkv, preferred_element_type=jnp.float32) + bqkv
        q = qkv[:, 0:H]
        k = qkv[:, H:2 * H]
        v = qkv[:, 2 * H:3 * H]

        attn_blocks = []
        for b in range(B):                                            # static unroll
            rows = slice(b * S, (b + 1) * S)                          # sublane-aligned
            qb, kb, vb = q[rows, :], k[rows, :], v[rows, :]
            bias_b = bias[b:b + 1, :]                                 # (1, S)
            acc = jnp.zeros((S, H), jnp.float32)
            for h in range(N_HEADS):                                  # static unroll
                cols = slice(h * D_HEAD, (h + 1) * D_HEAD)
                qh, kh, vh = qb[:, cols], kb[:, cols], vb[:, cols]
                s = jax.lax.dot_general(qh, kh, (((1,), (1,)), ((), ())),
                                        preferred_element_type=jnp.float32)
                s = s + bias_b                                        # (S, S)
                s = s - jnp.max(s, axis=-1, keepdims=True)
                p = jnp.exp(s)
                p = p * pl.reciprocal(jnp.sum(p, axis=-1, keepdims=True),
                                      approx=True)
                ctx = jnp.dot(p, vh, preferred_element_type=jnp.float32)
                # per-head output projection with a sublane-aligned Wo slice;
                # avoids the 8-lane-offset head concatenation.
                acc = acc + jnp.dot(ctx, wo[cols, :],
                                    preferred_element_type=jnp.float32)
            attn_blocks.append(acc)
        attn = jnp.concatenate(attn_blocks, axis=0) + bo              # (B*S, H)

        h1 = _layernorm(x + attn, g1_ref[l], be1_ref[l])
        ff = _gelu(jnp.dot(h1, w1_ref[l],
                           preferred_element_type=jnp.float32) + bi1_ref[l])
        ff = jnp.dot(ff, w2_ref[l],
                     preferred_element_type=jnp.float32) + bi2_ref[l]
        x = _layernorm(h1 + ff, g2_ref[l], be2_ref[l])

    # masked mean pooling (torch.clamp(min=1e-9) semantics)
    mcol = mask_col_ref[...]                                          # (B*S, 1)
    masked = x * mcol                                                 # (B*S, H)
    pooled = []
    for b in range(B):
        rows = slice(b * S, (b + 1) * S)
        sb = jnp.sum(masked[rows, :], axis=0, keepdims=True)          # (1, H)
        cb = jnp.maximum(jnp.sum(mcol[rows, :], axis=0, keepdims=True), 1e-9)
        pooled.append(sb * pl.reciprocal(cb, approx=True))
    o_ref[...] = jnp.concatenate(pooled, axis=0)                      # (B, H)


# ---------------------------------------------------------------------------
# parameter init / packing and full forward
# ---------------------------------------------------------------------------
def init_params(key):
    keys = iter(jax.random.split(key, 64))

    def nrm(shape):
        return 0.02 * jax.random.normal(next(keys), shape, dtype=jnp.float32)

    params = {
        "word_emb": nrm((VOCAB, H)),
        "pos_emb": nrm((MAX_POS, H)),
        "type_emb": nrm((TYPE_VOCAB, H)),
        "emb_ln_g": jnp.ones((1, H), jnp.float32),
        "emb_ln_b": jnp.zeros((1, H), jnp.float32),
        "layers": [],
    }
    for _ in range(N_LAYERS):
        params["layers"].append((
            nrm((H, H)), jnp.zeros((1, H), jnp.float32),    # Wq, bq
            nrm((H, H)), jnp.zeros((1, H), jnp.float32),    # Wk, bk
            nrm((H, H)), jnp.zeros((1, H), jnp.float32),    # Wv, bv
            nrm((H, H)), jnp.zeros((1, H), jnp.float32),    # Wo, bo
            jnp.ones((1, H), jnp.float32), jnp.zeros((1, H), jnp.float32),  # LN1
            nrm((H, INTER)), jnp.zeros((1, INTER), jnp.float32),            # W1, b1
            nrm((INTER, H)), jnp.zeros((1, H), jnp.float32),                # W2, b2
            jnp.ones((1, H), jnp.float32), jnp.zeros((1, H), jnp.float32),  # LN2
        ))
    return params


def pack_params(params):
    """One-time repack for the kernel: stack per-layer weights, fuse QKV and
    fold the 1/sqrt(d_head) attention scale into the Q projection."""
    scale = 1.0 / math.sqrt(D_HEAD)
    cols = [[] for _ in range(12)]
    for (wq, bq, wk, bk, wv, bv, wo, bo, g1, be1, w1, bi1, w2, bi2, g2, be2) \
            in params["layers"]:
        packed = (
            jnp.concatenate([wq * scale, wk, wv], axis=1),    # (H, 3H)
            jnp.concatenate([bq * scale, bk, bv], axis=1),    # (1, 3H)
            wo, bo, g1, be1, w1, bi1, w2, bi2, g2, be2,
        )
        for c, p in zip(cols, packed):
            c.append(p)
    stacked = tuple(jnp.stack(c, axis=0) for c in cols)
    return (params["emb_ln_g"], params["emb_ln_b"]) + stacked


def transformer_encoder_forward(params, input_ids, attention_mask, token_type_ids):
    b, s = input_ids.shape
    # embedding gather (word + position + token-type) stays in plain JAX
    emb = (jnp.take(params["word_emb"], input_ids, axis=0)
           + params["pos_emb"][None, :s, :]
           + jnp.take(params["type_emb"], token_type_ids, axis=0))
    emb2d = emb.reshape(b * s, H)                              # fold batch into sublanes
    mask_f = attention_mask.astype(jnp.float32)                # (B, S)   -> attn bias
    mask_col = mask_f.reshape(b * s, 1)                        # (B*S, 1) -> pooling

    packed = pack_params(params)

    # Single fused call, no grid: whole forward in VMEM, only (B, H) to HBM.
    return pl.pallas_call(
        fused_encoder_kernel,
        out_shape=jax.ShapeDtypeStruct((b, H), jnp.float32),
    )(emb2d, mask_f, mask_col, *packed)


# ---------------------------------------------------------------------------
# plain-JAX reference (same math, exact divides, unfused weights)
# ---------------------------------------------------------------------------
def reference_forward(params, input_ids, attention_mask, token_type_ids):
    b, s = input_ids.shape
    emb = (jnp.take(params["word_emb"], input_ids, axis=0)
           + params["pos_emb"][None, :s, :]
           + jnp.take(params["type_emb"], token_type_ids, axis=0))
    x = _layernorm(emb, params["emb_ln_g"], params["emb_ln_b"])
    bias = ((1.0 - attention_mask.astype(jnp.float32)) * NEG_BIAS)[:, None, None, :]
    for (wq, bq, wk, bk, wv, bv, wo, bo, g1, be1, w1, bi1, w2, bi2, g2, be2) \
            in params["layers"]:
        q = (x @ wq + bq).reshape(b, s, N_HEADS, D_HEAD).transpose(0, 2, 1, 3)
        k = (x @ wk + bk).reshape(b, s, N_HEADS, D_HEAD).transpose(0, 2, 1, 3)
        v = (x @ wv + bv).reshape(b, s, N_HEADS, D_HEAD).transpose(0, 2, 1, 3)
        sc = jnp.einsum("bhqd,bhkd->bhqk", q, k) / math.sqrt(D_HEAD) + bias
        p = jax.nn.softmax(sc, axis=-1)
        ctx = jnp.einsum("bhqk,bhkd->bhqd", p, v).transpose(0, 2, 1, 3).reshape(b, s, H)
        h1 = _layernorm(x + ctx @ wo + bo, g1, be1)
        ff = _gelu(h1 @ w1 + bi1) @ w2 + bi2
        x = _layernorm(h1 + ff, g2, be2)
    m = attention_mask.astype(jnp.float32)[:, :, None]
    return jnp.sum(x * m, axis=1) / jnp.maximum(jnp.sum(m, axis=1), 1e-9)


# ---------------------------------------------------------------------------
if __name__ == "__main__":
    key = jax.random.PRNGKey(0)
    k_param, k_ids = jax.random.split(key)

    params = init_params(k_param)

    input_ids = jax.random.randint(k_ids, (B, S), 0, VOCAB, dtype=jnp.int32)
    attention_mask = jnp.array([[1, 1, 1, 1, 1, 1, 1, 1],
                                [1, 1, 1, 1, 1, 0, 0, 0]], dtype=jnp.int32)
    token_type_ids = jnp.zeros((B, S), dtype=jnp.int32)

    fwd = jax.jit(transformer_encoder_forward)
    sentence_embeddings = jax.block_until_ready(
        fwd(params, input_ids, attention_mask, token_type_ids))

    ref = reference_forward(params, input_ids, attention_mask, token_type_ids)

    assert sentence_embeddings.shape == (B, H)
    assert bool(jnp.all(jnp.isfinite(sentence_embeddings)))
    # tolerance covers tanh-gelu and the approx-reciprocal softmax/pool divides
    assert bool(jnp.allclose(sentence_embeddings, ref, atol=5e-3, rtol=5e-3))

    print("KERNEL_OK")
</pallas_src>

<mosaic_0001>
module attributes {stable_mosaic.version = 11 : i64} {
  func.func @fused_encoder_kernel(%arg0: memref<16x32xf32, #tpu.memory_space<vmem>>, %arg1: memref<2x8xf32, #tpu.memory_space<vmem>>, %arg2: memref<16x1xf32, #tpu.memory_space<vmem>>, %arg3: memref<1x32xf32, #tpu.memory_space<vmem>>, %arg4: memref<1x32xf32, #tpu.memory_space<vmem>>, %arg5: memref<2x32x96xf32, #tpu.memory_space<vmem>>, %arg6: memref<2x1x96xf32, #tpu.memory_space<vmem>>, %arg7: memref<2x32x32xf32, #tpu.memory_space<vmem>>, %arg8: memref<2x1x32xf32, #tpu.memory_space<vmem>>, %arg9: memref<2x1x32xf32, #tpu.memory_space<vmem>>, %arg10: memref<2x1x32xf32, #tpu.memory_space<vmem>>, %arg11: memref<2x32x128xf32, #tpu.memory_space<vmem>>, %arg12: memref<2x1x128xf32, #tpu.memory_space<vmem>>, %arg13: memref<2x128x32xf32, #tpu.memory_space<vmem>>, %arg14: memref<2x1x32xf32, #tpu.memory_space<vmem>>, %arg15: memref<2x1x32xf32, #tpu.memory_space<vmem>>, %arg16: memref<2x1x32xf32, #tpu.memory_space<vmem>>, %arg17: memref<2x32xf32, #tpu.memory_space<vmem>>) attributes {dimension_semantics = [], scalar_prefetch = 0 : i64, scratch_operands = 0 : i64, tpu.core_type = #tpu.core_type<tc>} {
    %c0 = arith.constant 0 : index
    %c0_0 = arith.constant 0 : index
    %0 = vector.load %arg0[%c0, %c0_0] : memref<16x32xf32, #tpu.memory_space<vmem>>, vector<16x32xf32>
    %c0_1 = arith.constant 0 : index
    %c0_2 = arith.constant 0 : index
    %1 = vector.load %arg3[%c0_1, %c0_2] : memref<1x32xf32, #tpu.memory_space<vmem>>, vector<1x32xf32>
    %c0_3 = arith.constant 0 : index
    %c0_4 = arith.constant 0 : index
    %2 = vector.load %arg4[%c0_3, %c0_4] : memref<1x32xf32, #tpu.memory_space<vmem>>, vector<1x32xf32>
    %cst = arith.constant dense<0.000000e+00> : vector<16xf32>
    %3 = vector.multi_reduction <add>, %0, %cst [1] : vector<16x32xf32> to vector<16xf32>
    %4 = vector.shape_cast %3 : vector<16xf32> to vector<16x1xf32>
    %cst_5 = arith.constant 3.200000e+01 : f32
    %5 = vector.broadcast %cst_5 : f32 to vector<16x1xf32>
    %6 = arith.divf %4, %5 : vector<16x1xf32>
    %7 = vector.broadcast %6 : vector<16x1xf32> to vector<16x32xf32>
    %8 = arith.subf %0, %7 : vector<16x32xf32>
    %9 = arith.mulf %8, %8 : vector<16x32xf32>
    %cst_6 = arith.constant dense<0.000000e+00> : vector<16xf32>
    %10 = vector.multi_reduction <add>, %9, %cst_6 [1] : vector<16x32xf32> to vector<16xf32>
    %11 = vector.shape_cast %10 : vector<16xf32> to vector<16x1xf32>
    %cst_7 = arith.constant 3.200000e+01 : f32
    %12 = vector.broadcast %cst_7 : f32 to vector<16x1xf32>
    %13 = arith.divf %11, %12 : vector<16x1xf32>
    %14 = vector.broadcast %6 : vector<16x1xf32> to vector<16x32xf32>
    %15 = arith.subf %0, %14 : vector<16x32xf32>
    %cst_8 = arith.constant 9.99999996E-13 : f32
    %16 = vector.broadcast %cst_8 : f32 to vector<16x1xf32>
    %17 = arith.addf %13, %16 : vector<16x1xf32>
    %18 = math.rsqrt %17 : vector<16x1xf32>
    %19 = vector.broadcast %18 : vector<16x1xf32> to vector<16x32xf32>
    %20 = arith.mulf %15, %19 : vector<16x32xf32>
    %21 = vector.broadcast %1 : vector<1x32xf32> to vector<16x32xf32>
    %22 = arith.mulf %20, %21 : vector<16x32xf32>
    %23 = vector.broadcast %2 : vector<1x32xf32> to vector<16x32xf32>
    %24 = arith.addf %22, %23 : vector<16x32xf32>
    %c0_9 = arith.constant 0 : index
    %c0_10 = arith.constant 0 : index
    %25 = vector.load %arg1[%c0_9, %c0_10] : memref<2x8xf32, #tpu.memory_space<vmem>>, vector<2x8xf32>
    %cst_11 = arith.constant 1.000000e+00 : f32
    %26 = vector.broadcast %cst_11 : f32 to vector<2x8xf32>
    %27 = arith.subf %26, %25 : vector<2x8xf32>
    %cst_12 = arith.constant -1.000000e+09 : f32
    %28 = vector.broadcast %cst_12 : f32 to vector<2x8xf32>
    %29 = arith.mulf %27, %28 : vector<2x8xf32>
    %c0_13 = arith.constant 0 : index
    %c0_14 = arith.constant 0 : index
    %c0_15 = arith.constant 0 : index
    %30 = vector.load %arg5[%c0_13, %c0_14, %c0_15] : memref<2x32x96xf32, #tpu.memory_space<vmem>>, vector<1x32x96xf32>
    %31 = vector.shape_cast %30 : vector<1x32x96xf32> to vector<32x96xf32>
    %c0_16 = arith.constant 0 : index
    %c0_17 = arith.constant 0 : index
    %c0_18 = arith.constant 0 : index
    %32 = vector.load %arg6[%c0_16, %c0_17, %c0_18] : memref<2x1x96xf32, #tpu.memory_space<vmem>>, vector<1x1x96xf32>
    %33 = vector.shape_cast %32 : vector<1x1x96xf32> to vector<1x96xf32>
    %c0_19 = arith.constant 0 : index
    %c0_20 = arith.constant 0 : index
    %c0_21 = arith.constant 0 : index
    %34 = vector.load %arg7[%c0_19, %c0_20, %c0_21] : memref<2x32x32xf32, #tpu.memory_space<vmem>>, vector<1x32x32xf32>
    %35 = vector.shape_cast %34 : vector<1x32x32xf32> to vector<32x32xf32>
    %c0_22 = arith.constant 0 : index
    %c0_23 = arith.constant 0 : index
    %c0_24 = arith.constant 0 : index
    %36 = vector.load %arg8[%c0_22, %c0_23, %c0_24] : memref<2x1x32xf32, #tpu.memory_space<vmem>>, vector<1x1x32xf32>
    %37 = vector.shape_cast %36 : vector<1x1x32xf32> to vector<1x32xf32>
    %cst_25 = arith.constant dense<0.000000e+00> : vector<16x96xf32>
    %38 = tpu.matmul %24, %31, %cst_25 {dimension_numbers = #tpu.dot_dimension_numbers<[1], [0], [0], [1], [0, 0, 1, 1], [], []>} : vector<16x32xf32>, vector<32x96xf32>, vector<16x96xf32> -> vector<16x96xf32>
    %39 = vector.broadcast %33 : vector<1x96xf32> to vector<16x96xf32>
    %40 = arith.addf %38, %39 : vector<16x96xf32>
    %41 = vector.extract_strided_slice %40 {offsets = [0, 0], sizes = [16, 32], strides = [1, 1]} : vector<16x96xf32> to vector<16x32xf32>
    %42 = vector.extract_strided_slice %40 {offsets = [0, 32], sizes = [16, 32], strides = [1, 1]} : vector<16x96xf32> to vector<16x32xf32>
    %43 = vector.extract_strided_slice %40 {offsets = [0, 64], sizes = [16, 32], strides = [1, 1]} : vector<16x96xf32> to vector<16x32xf32>
    %44 = vector.extract_strided_slice %41 {offsets = [0, 0], sizes = [8, 32], strides = [1, 1]} : vector<16x32xf32> to vector<8x32xf32>
    %45 = vector.extract_strided_slice %42 {offsets = [0, 0], sizes = [8, 32], strides = [1, 1]} : vector<16x32xf32> to vector<8x32xf32>
    %46 = vector.extract_strided_slice %43 {offsets = [0, 0], sizes = [8, 32], strides = [1, 1]} : vector<16x32xf32> to vector<8x32xf32>
    %47 = vector.extract_strided_slice %29 {offsets = [0, 0], sizes = [1, 8], strides = [1, 1]} : vector<2x8xf32> to vector<1x8xf32>
    %cst_26 = arith.constant 0.000000e+00 : f32
    %48 = vector.broadcast %cst_26 : f32 to vector<8x32xf32>
    %49 = vector.extract_strided_slice %44 {offsets = [0, 0], sizes = [8, 8], strides = [1, 1]} : vector<8x32xf32> to vector<8x8xf32>
    %50 = vector.extract_strided_slice %45 {offsets = [0, 0], sizes = [8, 8], strides = [1, 1]} : vector<8x32xf32> to vector<8x8xf32>
    %51 = vector.extract_strided_slice %46 {offsets = [0, 0], sizes = [8, 8], strides = [1, 1]} : vector<8x32xf32> to vector<8x8xf32>
    %cst_27 = arith.constant dense<0.000000e+00> : vector<8x8xf32>
    %52 = tpu.matmul %49, %50, %cst_27 {dimension_numbers = #tpu.dot_dimension_numbers<[1], [1], [0], [0], [0, 0, 1, 0], [], []>} : vector<8x8xf32>, vector<8x8xf32>, vector<8x8xf32> -> vector<8x8xf32>
    %53 = vector.broadcast %47 : vector<1x8xf32> to vector<8x8xf32>
    %54 = arith.addf %52, %53 : vector<8x8xf32>
    %cst_28 = arith.constant dense<0xFF800000> : vector<8xf32>
    %55 = vector.multi_reduction <maximumf>, %54, %cst_28 [1] : vector<8x8xf32> to vector<8xf32>
    %56 = vector.shape_cast %55 : vector<8xf32> to vector<8x1xf32>
    %57 = vector.broadcast %56 : vector<8x1xf32> to vector<8x8xf32>
    %58 = arith.subf %54, %57 : vector<8x8xf32>
    %59 = math.exp %58 : vector<8x8xf32>
    %cst_29 = arith.constant dense<0.000000e+00> : vector<8xf32>
    %60 = vector.multi_reduction <add>, %59, %cst_29 [1] : vector<8x8xf32> to vector<8xf32>
    %61 = vector.shape_cast %60 : vector<8xf32> to vector<8x1xf32>
    %62 = tpu.reciprocal %61 {approx = true} : vector<8x1xf32> -> vector<8x1xf32>
    %63 = vector.broadcast %62 : vector<8x1xf32> to vector<8x8xf32>
    %64 = arith.mulf %59, %63 : vector<8x8xf32>
    %cst_30 = arith.constant dense<0.000000e+00> : vector<8x8xf32>
    %65 = tpu.matmul %64, %51, %cst_30 {dimension_numbers = #tpu.dot_dimension_numbers<[1], [0], [0], [1], [0, 0, 1, 1], [], []>} : vector<8x8xf32>, vector<8x8xf32>, vector<8x8xf32> -> vector<8x8xf32>
    %66 = vector.extract_strided_slice %35 {offsets = [0, 0], sizes = [8, 32], strides = [1, 1]} : vector<32x32xf32> to vector<8x32xf32>
    %cst_31 = arith.constant dense<0.000000e+00> : vector<8x32xf32>
    %67 = tpu.matmul %65, %66, %cst_31 {dimension_numbers = #tpu.dot_dimension_numbers<[1], [0], [0], [1], [0, 0, 1, 1], [], []>} : vector<8x8xf32>, vector<8x32xf32>, vector<8x32xf32> -> vector<8x32xf32>
    %68 = arith.addf %48, %67 : vector<8x32xf32>
    %69 = vector.extract_strided_slice %44 {offsets = [0, 8], sizes = [8, 8], strides = [1, 1]} : vector<8x32xf32> to vector<8x8xf32>
    %70 = vector.extract_strided_slice %45 {offsets = [0, 8], sizes = [8, 8], strides = [1, 1]} : vector<8x32xf32> to vector<8x8xf32>
    %71 = vector.extract_strided_slice %46 {offsets = [0, 8], sizes = [8, 8], strides = [1, 1]} : vector<8x32xf32> to vector<8x8xf32>
    %cst_32 = arith.constant dense<0.000000e+00> : vector<8x8xf32>
    %72 = tpu.matmul %69, %70, %cst_32 {dimension_numbers = #tpu.dot_dimension_numbers<[1], [1], [0], [0], [0, 0, 1, 0], [], []>} : vector<8x8xf32>, vector<8x8xf32>, vector<8x8xf32> -> vector<8x8xf32>
    %73 = vector.broadcast %47 : vector<1x8xf32> to vector<8x8xf32>
    %74 = arith.addf %72, %73 : vector<8x8xf32>
    %cst_33 = arith.constant dense<0xFF800000> : vector<8xf32>
    %75 = vector.multi_reduction <maximumf>, %74, %cst_33 [1] : vector<8x8xf32> to vector<8xf32>
    %76 = vector.shape_cast %75 : vector<8xf32> to vector<8x1xf32>
    %77 = vector.broadcast %76 : vector<8x1xf32> to vector<8x8xf32>
    %78 = arith.subf %74, %77 : vector<8x8xf32>
    %79 = math.exp %78 : vector<8x8xf32>
    %cst_34 = arith.constant dense<0.000000e+00> : vector<8xf32>
    %80 = vector.multi_reduction <add>, %79, %cst_34 [1] : vector<8x8xf32> to vector<8xf32>
    %81 = vector.shape_cast %80 : vector<8xf32> to vector<8x1xf32>
    %82 = tpu.reciprocal %81 {approx = true} : vector<8x1xf32> -> vector<8x1xf32>
    %83 = vector.broadcast %82 : vector<8x1xf32> to vector<8x8xf32>
    %84 = arith.mulf %79, %83 : vector<8x8xf32>
    %cst_35 = arith.constant dense<0.000000e+00> : vector<8x8xf32>
    %85 = tpu.matmul %84, %71, %cst_35 {dimension_numbers = #tpu.dot_dimension_numbers<[1], [0], [0], [1], [0, 0, 1, 1], [], []>} : vector<8x8xf32>, vector<8x8xf32>, vector<8x8xf32> -> vector<8x8xf32>
    %86 = vector.extract_strided_slice %35 {offsets = [8, 0], sizes = [8, 32], strides = [1, 1]} : vector<32x32xf32> to vector<8x32xf32>
    %cst_36 = arith.constant dense<0.000000e+00> : vector<8x32xf32>
    %87 = tpu.matmul %85, %86, %cst_36 {dimension_numbers = #tpu.dot_dimension_numbers<[1], [0], [0], [1], [0, 0, 1, 1], [], []>} : vector<8x8xf32>, vector<8x32xf32>, vector<8x32xf32> -> vector<8x32xf32>
    %88 = arith.addf %68, %87 : vector<8x32xf32>
    %89 = vector.extract_strided_slice %44 {offsets = [0, 16], sizes = [8, 8], strides = [1, 1]} : vector<8x32xf32> to vector<8x8xf32>
    %90 = vector.extract_strided_slice %45 {offsets = [0, 16], sizes = [8, 8], strides = [1, 1]} : vector<8x32xf32> to vector<8x8xf32>
    %91 = vector.extract_strided_slice %46 {offsets = [0, 16], sizes = [8, 8], strides = [1, 1]} : vector<8x32xf32> to vector<8x8xf32>
    %cst_37 = arith.constant dense<0.000000e+00> : vector<8x8xf32>
    %92 = tpu.matmul %89, %90, %cst_37 {dimension_numbers = #tpu.dot_dimension_numbers<[1], [1], [0], [0], [0, 0, 1, 0], [], []>} : vector<8x8xf32>, vector<8x8xf32>, vector<8x8xf32> -> vector<8x8xf32>
    %93 = vector.broadcast %47 : vector<1x8xf32> to vector<8x8xf32>
    %94 = arith.addf %92, %93 : vector<8x8xf32>
    %cst_38 = arith.constant dense<0xFF800000> : vector<8xf32>
    %95 = vector.multi_reduction <maximumf>, %94, %cst_38 [1] : vector<8x8xf32> to vector<8xf32>
    %96 = vector.shape_cast %95 : vector<8xf32> to vector<8x1xf32>
    %97 = vector.broadcast %96 : vector<8x1xf32> to vector<8x8xf32>
    %98 = arith.subf %94, %97 : vector<8x8xf32>
    %99 = math.exp %98 : vector<8x8xf32>
    %cst_39 = arith.constant dense<0.000000e+00> : vector<8xf32>
    %100 = vector.multi_reduction <add>, %99, %cst_39 [1] : vector<8x8xf32> to vector<8xf32>
    %101 = vector.shape_cast %100 : vector<8xf32> to vector<8x1xf32>
    %102 = tpu.reciprocal %101 {approx = true} : vector<8x1xf32> -> vector<8x1xf32>
    %103 = vector.broadcast %102 : vector<8x1xf32> to vector<8x8xf32>
    %104 = arith.mulf %99, %103 : vector<8x8xf32>
    %cst_40 = arith.constant dense<0.000000e+00> : vector<8x8xf32>
    %105 = tpu.matmul %104, %91, %cst_40 {dimension_numbers = #tpu.dot_dimension_numbers<[1], [0], [0], [1], [0, 0, 1, 1], [], []>} : vector<8x8xf32>, vector<8x8xf32>, vector<8x8xf32> -> vector<8x8xf32>
    %106 = vector.extract_strided_slice %35 {offsets = [16, 0], sizes = [8, 32], strides = [1, 1]} : vector<32x32xf32> to vector<8x32xf32>
    %cst_41 = arith.constant dense<0.000000e+00> : vector<8x32xf32>
    %107 = tpu.matmul %105, %106, %cst_41 {dimension_numbers = #tpu.dot_dimension_numbers<[1], [0], [0], [1], [0, 0, 1, 1], [], []>} : vector<8x8xf32>, vector<8x32xf32>, vector<8x32xf32> -> vector<8x32xf32>
    %108 = arith.addf %88, %107 : vector<8x32xf32>
    %109 = vector.extract_strided_slice %44 {offsets = [0, 24], sizes = [8, 8], strides = [1, 1]} : vector<8x32xf32> to vector<8x8xf32>
    %110 = vector.extract_strided_slice %45 {offsets = [0, 24], sizes = [8, 8], strides = [1, 1]} : vector<8x32xf32> to vector<8x8xf32>
    %111 = vector.extract_strided_slice %46 {offsets = [0, 24], sizes = [8, 8], strides = [1, 1]} : vector<8x32xf32> to vector<8x8xf32>
    %cst_42 = arith.constant dense<0.000000e+00> : vector<8x8xf32>
    %112 = tpu.matmul %109, %110, %cst_42 {dimension_numbers = #tpu.dot_dimension_numbers<[1], [1], [0], [0], [0, 0, 1, 0], [], []>} : vector<8x8xf32>, vector<8x8xf32>, vector<8x8xf32> -> vector<8x8xf32>
    %113 = vector.broadcast %47 : vector<1x8xf32> to vector<8x8xf32>
    %114 = arith.addf %112, %113 : vector<8x8xf32>
    %cst_43 = arith.constant dense<0xFF800000> : vector<8xf32>
    %115 = vector.multi_reduction <maximumf>, %114, %cst_43 [1] : vector<8x8xf32> to vector<8xf32>
    %116 = vector.shape_cast %115 : vector<8xf32> to vector<8x1xf32>
    %117 = vector.broadcast %116 : vector<8x1xf32> to vector<8x8xf32>
    %118 = arith.subf %114, %117 : vector<8x8xf32>
    %119 = math.exp %118 : vector<8x8xf32>
    %cst_44 = arith.constant dense<0.000000e+00> : vector<8xf32>
    %120 = vector.multi_reduction <add>, %119, %cst_44 [1] : vector<8x8xf32> to vector<8xf32>
    %121 = vector.shape_cast %120 : vector<8xf32> to vector<8x1xf32>
    %122 = tpu.reciprocal %121 {approx = true} : vector<8x1xf32> -> vector<8x1xf32>
    %123 = vector.broadcast %122 : vector<8x1xf32> to vector<8x8xf32>
    %124 = arith.mulf %119, %123 : vector<8x8xf32>
    %cst_45 = arith.constant dense<0.000000e+00> : vector<8x8xf32>
    %125 = tpu.matmul %124, %111, %cst_45 {dimension_numbers = #tpu.dot_dimension_numbers<[1], [0], [0], [1], [0, 0, 1, 1], [], []>} : vector<8x8xf32>, vector<8x8xf32>, vector<8x8xf32> -> vector<8x8xf32>
    %126 = vector.extract_strided_slice %35 {offsets = [24, 0], sizes = [8, 32], strides = [1, 1]} : vector<32x32xf32> to vector<8x32xf32>
    %cst_46 = arith.constant dense<0.000000e+00> : vector<8x32xf32>
    %127 = tpu.matmul %125, %126, %cst_46 {dimension_numbers = #tpu.dot_dimension_numbers<[1], [0], [0], [1], [0, 0, 1, 1], [], []>} : vector<8x8xf32>, vector<8x32xf32>, vector<8x32xf32> -> vector<8x32xf32>
    %128 = arith.addf %108, %127 : vector<8x32xf32>
    %129 = vector.extract_strided_slice %41 {offsets = [8, 0], sizes = [8, 32], strides = [1, 1]} : vector<16x32xf32> to vector<8x32xf32>
    %130 = vector.extract_strided_slice %42 {offsets = [8, 0], sizes = [8, 32], strides = [1, 1]} : vector<16x32xf32> to vector<8x32xf32>
    %131 = vector.extract_strided_slice %43 {offsets = [8, 0], sizes = [8, 32], strides = [1, 1]} : vector<16x32xf32> to vector<8x32xf32>
    %132 = vector.extract_strided_slice %29 {offsets = [1, 0], sizes = [1, 8], strides = [1, 1]} : vector<2x8xf32> to vector<1x8xf32>
    %cst_47 = arith.constant 0.000000e+00 : f32
    %133 = vector.broadcast %cst_47 : f32 to vector<8x32xf32>
    %134 = vector.extract_strided_slice %129 {offsets = [0, 0], sizes = [8, 8], strides = [1, 1]} : vector<8x32xf32> to vector<8x8xf32>
    %135 = vector.extract_strided_slice %130 {offsets = [0, 0], sizes = [8, 8], strides = [1, 1]} : vector<8x32xf32> to vector<8x8xf32>
    %136 = vector.extract_strided_slice %131 {offsets = [0, 0], sizes = [8, 8], strides = [1, 1]} : vector<8x32xf32> to vector<8x8xf32>
    %cst_48 = arith.constant dense<0.000000e+00> : vector<8x8xf32>
    %137 = tpu.matmul %134, %135, %cst_48 {dimension_numbers = #tpu.dot_dimension_numbers<[1], [1], [0], [0], [0, 0, 1, 0], [], []>} : vector<8x8xf32>, vector<8x8xf32>, vector<8x8xf32> -> vector<8x8xf32>
    %138 = vector.broadcast %132 : vector<1x8xf32> to vector<8x8xf32>
    %139 = arith.addf %137, %138 : vector<8x8xf32>
    %cst_49 = arith.constant dense<0xFF800000> : vector<8xf32>
    %140 = vector.multi_reduction <maximumf>, %139, %cst_49 [1] : vector<8x8xf32> to vector<8xf32>
    %141 = vector.shape_cast %140 : vector<8xf32> to vector<8x1xf32>
    %142 = vector.broadcast %141 : vector<8x1xf32> to vector<8x8xf32>
    %143 = arith.subf %139, %142 : vector<8x8xf32>
    %144 = math.exp %143 : vector<8x8xf32>
    %cst_50 = arith.constant dense<0.000000e+00> : vector<8xf32>
    %145 = vector.multi_reduction <add>, %144, %cst_50 [1] : vector<8x8xf32> to vector<8xf32>
    %146 = vector.shape_cast %145 : vector<8xf32> to vector<8x1xf32>
    %147 = tpu.reciprocal %146 {approx = true} : vector<8x1xf32> -> vector<8x1xf32>
    %148 = vector.broadcast %147 : vector<8x1xf32> to vector<8x8xf32>
    %149 = arith.mulf %144, %148 : vector<8x8xf32>
    %cst_51 = arith.constant dense<0.000000e+00> : vector<8x8xf32>
    %150 = tpu.matmul %149, %136, %cst_51 {dimension_numbers = #tpu.dot_dimension_numbers<[1], [0], [0], [1], [0, 0, 1, 1], [], []>} : vector<8x8xf32>, vector<8x8xf32>, vector<8x8xf32> -> vector<8x8xf32>
    %151 = vector.extract_strided_slice %35 {offsets = [0, 0], sizes = [8, 32], strides = [1, 1]} : vector<32x32xf32> to vector<8x32xf32>
    %cst_52 = arith.constant dense<0.000000e+00> : vector<8x32xf32>
    %152 = tpu.matmul %150, %151, %cst_52 {dimension_numbers = #tpu.dot_dimension_numbers<[1], [0], [0], [1], [0, 0, 1, 1], [], []>} : vector<8x8xf32>, vector<8x32xf32>, vector<8x32xf32> -> vector<8x32xf32>
    %153 = arith.addf %133, %152 : vector<8x32xf32>
    %154 = vector.extract_strided_slice %129 {offsets = [0, 8], sizes = [8, 8], strides = [1, 1]} : vector<8x32xf32> to vector<8x8xf32>
    %155 = vector.extract_strided_slice %130 {offsets = [0, 8], sizes = [8, 8], strides = [1, 1]} : vector<8x32xf32> to vector<8x8xf32>
    %156 = vector.extract_strided_slice %131 {offsets = [0, 8], sizes = [8, 8], strides = [1, 1]} : vector<8x32xf32> to vector<8x8xf32>
    %cst_53 = arith.constant dense<0.000000e+00> : vector<8x8xf32>
    %157 = tpu.matmul %154, %155, %cst_53 {dimension_numbers = #tpu.dot_dimension_numbers<[1], [1], [0], [0], [0, 0, 1, 0], [], []>} : vector<8x8xf32>, vector<8x8xf32>, vector<8x8xf32> -> vector<8x8xf32>
    %158 = vector.broadcast %132 : vector<1x8xf32> to vector<8x8xf32>
    %159 = arith.addf %157, %158 : vector<8x8xf32>
    %cst_54 = arith.constant dense<0xFF800000> : vector<8xf32>
    %160 = vector.multi_reduction <maximumf>, %159, %cst_54 [1] : vector<8x8xf32> to vector<8xf32>
    %161 = vector.shape_cast %160 : vector<8xf32> to vector<8x1xf32>
    %162 = vector.broadcast %161 : vector<8x1xf32> to vector<8x8xf32>
    %163 = arith.subf %159, %162 : vector<8x8xf32>
    %164 = math.exp %163 : vector<8x8xf32>
    %cst_55 = arith.constant dense<0.000000e+00> : vector<8xf32>
    %165 = vector.multi_reduction <add>, %164, %cst_55 [1] : vector<8x8xf32> to vector<8xf32>
    %166 = vector.shape_cast %165 : vector<8xf32> to vector<8x1xf32>
    %167 = tpu.reciprocal %166 {approx = true} : vector<8x1xf32> -> vector<8x1xf32>
    %168 = vector.broadcast %167 : vector<8x1xf32> to vector<8x8xf32>
    %169 = arith.mulf %164, %168 : vector<8x8xf32>
    %cst_56 = arith.constant dense<0.000000e+00> : vector<8x8xf32>
    %170 = tpu.matmul %169, %156, %cst_56 {dimension_numbers = #tpu.dot_dimension_numbers<[1], [0], [0], [1], [0, 0, 1, 1], [], []>} : vector<8x8xf32>, vector<8x8xf32>, vector<8x8xf32> -> vector<8x8xf32>
    %171 = vector.extract_strided_slice %35 {offsets = [8, 0], sizes = [8, 32], strides = [1, 1]} : vector<32x32xf32> to vector<8x32xf32>
    %cst_57 = arith.constant dense<0.000000e+00> : vector<8x32xf32>
    %172 = tpu.matmul %170, %171, %cst_57 {dimension_numbers = #tpu.dot_dimension_numbers<[1], [0], [0], [1], [0, 0, 1, 1], [], []>} : vector<8x8xf32>, vector<8x32xf32>, vector<8x32xf32> -> vector<8x32xf32>
    %173 = arith.addf %153, %172 : vector<8x32xf32>
    %174 = vector.extract_strided_slice %129 {offsets = [0, 16], sizes = [8, 8], strides = [1, 1]} : vector<8x32xf32> to vector<8x8xf32>
    %175 = vector.extract_strided_slice %130 {offsets = [0, 16], sizes = [8, 8], strides = [1, 1]} : vector<8x32xf32> to vector<8x8xf32>
    %176 = vector.extract_strided_slice %131 {offsets = [0, 16], sizes = [8, 8], strides = [1, 1]} : vector<8x32xf32> to vector<8x8xf32>
    %cst_58 = arith.constant dense<0.000000e+00> : vector<8x8xf32>
    %177 = tpu.matmul %174, %175, %cst_58 {dimension_numbers = #tpu.dot_dimension_numbers<[1], [1], [0], [0], [0, 0, 1, 0], [], []>} : vector<8x8xf32>, vector<8x8xf32>, vector<8x8xf32> -> vector<8x8xf32>
    %178 = vector.broadcast %132 : vector<1x8xf32> to vector<8x8xf32>
    %179 = arith.addf %177, %178 : vector<8x8xf32>
    %cst_59 = arith.constant dense<0xFF800000> : vector<8xf32>
    %180 = vector.multi_reduction <maximumf>, %179, %cst_59 [1] : vector<8x8xf32> to vector<8xf32>
    %181 = vector.shape_cast %180 : vector<8xf32> to vector<8x1xf32>
    %182 = vector.broadcast %181 : vector<8x1xf32> to vector<8x8xf32>
    %183 = arith.subf %179, %182 : vector<8x8xf32>
    %184 = math.exp %183 : vector<8x8xf32>
    %cst_60 = arith.constant dense<0.000000e+00> : vector<8xf32>
    %185 = vector.multi_reduction <add>, %184, %cst_60 [1] : vector<8x8xf32> to vector<8xf32>
    %186 = vector.shape_cast %185 : vector<8xf32> to vector<8x1xf32>
    %187 = tpu.reciprocal %186 {approx = true} : vector<8x1xf32> -> vector<8x1xf32>
    %188 = vector.broadcast %187 : vector<8x1xf32> to vector<8x8xf32>
    %189 = arith.mulf %184, %188 : vector<8x8xf32>
    %cst_61 = arith.constant dense<0.000000e+00> : vector<8x8xf32>
    %190 = tpu.matmul %189, %176, %cst_61 {dimension_numbers = #tpu.dot_dimension_numbers<[1], [0], [0], [1], [0, 0, 1, 1], [], []>} : vector<8x8xf32>, vector<8x8xf32>, vector<8x8xf32> -> vector<8x8xf32>
    %191 = vector.extract_strided_slice %35 {offsets = [16, 0], sizes = [8, 32], strides = [1, 1]} : vector<32x32xf32> to vector<8x32xf32>
    %cst_62 = arith.constant dense<0.000000e+00> : vector<8x32xf32>
    %192 = tpu.matmul %190, %191, %cst_62 {dimension_numbers = #tpu.dot_dimension_numbers<[1], [0], [0], [1], [0, 0, 1, 1], [], []>} : vector<8x8xf32>, vector<8x32xf32>, vector<8x32xf32> -> vector<8x32xf32>
    %193 = arith.addf %173, %192 : vector<8x32xf32>
    %194 = vector.extract_strided_slice %129 {offsets = [0, 24], sizes = [8, 8], strides = [1, 1]} : vector<8x32xf32> to vector<8x8xf32>
    %195 = vector.extract_strided_slice %130 {offsets = [0, 24], sizes = [8, 8], strides = [1, 1]} : vector<8x32xf32> to vector<8x8xf32>
    %196 = vector.extract_strided_slice %131 {offsets = [0, 24], sizes = [8, 8], strides = [1, 1]} : vector<8x32xf32> to vector<8x8xf32>
    %cst_63 = arith.constant dense<0.000000e+00> : vector<8x8xf32>
    %197 = tpu.matmul %194, %195, %cst_63 {dimension_numbers = #tpu.dot_dimension_numbers<[1], [1], [0], [0], [0, 0, 1, 0], [], []>} : vector<8x8xf32>, vector<8x8xf32>, vector<8x8xf32> -> vector<8x8xf32>
    %198 = vector.broadcast %132 : vector<1x8xf32> to vector<8x8xf32>
    %199 = arith.addf %197, %198 : vector<8x8xf32>
    %cst_64 = arith.constant dense<0xFF800000> : vector<8xf32>
    %200 = vector.multi_reduction <maximumf>, %199, %cst_64 [1] : vector<8x8xf32> to vector<8xf32>
    %201 = vector.shape_cast %200 : vector<8xf32> to vector<8x1xf32>
    %202 = vector.broadcast %201 : vector<8x1xf32> to vector<8x8xf32>
    %203 = arith.subf %199, %202 : vector<8x8xf32>
    %204 = math.exp %203 : vector<8x8xf32>
    %cst_65 = arith.constant dense<0.000000e+00> : vector<8xf32>
    %205 = vector.multi_reduction <add>, %204, %cst_65 [1] : vector<8x8xf32> to vector<8xf32>
    %206 = vector.shape_cast %205 : vector<8xf32> to vector<8x1xf32>
    %207 = tpu.reciprocal %206 {approx = true} : vector<8x1xf32> -> vector<8x1xf32>
    %208 = vector.broadcast %207 : vector<8x1xf32> to vector<8x8xf32>
    %209 = arith.mulf %204, %208 : vector<8x8xf32>
    %cst_66 = arith.constant dense<0.000000e+00> : vector<8x8xf32>
    %210 = tpu.matmul %209, %196, %cst_66 {dimension_numbers = #tpu.dot_dimension_numbers<[1], [0], [0], [1], [0, 0, 1, 1], [], []>} : vector<8x8xf32>, vector<8x8xf32>, vector<8x8xf32> -> vector<8x8xf32>
    %211 = vector.extract_strided_slice %35 {offsets = [24, 0], sizes = [8, 32], strides = [1, 1]} : vector<32x32xf32> to vector<8x32xf32>
    %cst_67 = arith.constant dense<0.000000e+00> : vector<8x32xf32>
    %212 = tpu.matmul %210, %211, %cst_67 {dimension_numbers = #tpu.dot_dimension_numbers<[1], [0], [0], [1], [0, 0, 1, 1], [], []>} : vector<8x8xf32>, vector<8x32xf32>, vector<8x32xf32> -> vector<8x32xf32>
    %213 = arith.addf %193, %212 : vector<8x32xf32>
    %214 = tpu.concatenate %128, %213 in 0 : vector<8x32xf32>, vector<8x32xf32> -> vector<16x32xf32>
    %215 = vector.broadcast %37 : vector<1x32xf32> to vector<16x32xf32>
    %216 = arith.addf %214, %215 : vector<16x32xf32>
    %217 = arith.addf %24, %216 : vector<16x32xf32>
    %c0_68 = arith.constant 0 : index
    %c0_69 = arith.constant 0 : index
    %c0_70 = arith.constant 0 : index
    %218 = vector.load %arg9[%c0_68, %c0_69, %c0_70] : memref<2x1x32xf32, #tpu.memory_space<vmem>>, vector<1x1x32xf32>
    %219 = vector.shape_cast %218 : vector<1x1x32xf32> to vector<1x32xf32>
    %c0_71 = arith.constant 0 : index
    %c0_72 = arith.constant 0 : index
    %c0_73 = arith.constant 0 : index
    %220 = vector.load %arg10[%c0_71, %c0_72, %c0_73] : memref<2x1x32xf32, #tpu.memory_space<vmem>>, vector<1x1x32xf32>
    %221 = vector.shape_cast %220 : vector<1x1x32xf32> to vector<1x32xf32>
    %cst_74 = arith.constant dense<0.000000e+00> : vector<16xf32>
    %222 = vector.multi_reduction <add>, %217, %cst_74 [1] : vector<16x32xf32> to vector<16xf32>
    %223 = vector.shape_cast %222 : vector<16xf32> to vector<16x1xf32>
    %cst_75 = arith.constant 3.200000e+01 : f32
    %224 = vector.broadcast %cst_75 : f32 to vector<16x1xf32>
    %225 = arith.divf %223, %224 : vector<16x1xf32>
    %226 = vector.broadcast %225 : vector<16x1xf32> to vector<16x32xf32>
    %227 = arith.subf %217, %226 : vector<16x32xf32>
    %228 = arith.mulf %227, %227 : vector<16x32xf32>
    %cst_76 = arith.constant dense<0.000000e+00> : vector<16xf32>
    %229 = vector.multi_reduction <add>, %228, %cst_76 [1] : vector<16x32xf32> to vector<16xf32>
    %230 = vector.shape_cast %229 : vector<16xf32> to vector<16x1xf32>
    %cst_77 = arith.constant 3.200000e+01 : f32
    %231 = vector.broadcast %cst_77 : f32 to vector<16x1xf32>
    %232 = arith.divf %230, %231 : vector<16x1xf32>
    %233 = vector.broadcast %225 : vector<16x1xf32> to vector<16x32xf32>
    %234 = arith.subf %217, %233 : vector<16x32xf32>
    %cst_78 = arith.constant 9.99999996E-13 : f32
    %235 = vector.broadcast %cst_78 : f32 to vector<16x1xf32>
    %236 = arith.addf %232, %235 : vector<16x1xf32>
    %237 = math.rsqrt %236 : vector<16x1xf32>
    %238 = vector.broadcast %237 : vector<16x1xf32> to vector<16x32xf32>
    %239 = arith.mulf %234, %238 : vector<16x32xf32>
    %240 = vector.broadcast %219 : vector<1x32xf32> to vector<16x32xf32>
    %241 = arith.mulf %239, %240 : vector<16x32xf32>
    %242 = vector.broadcast %221 : vector<1x32xf32> to vector<16x32xf32>
    %243 = arith.addf %241, %242 : vector<16x32xf32>
    %c0_79 = arith.constant 0 : index
    %c0_80 = arith.constant 0 : index
    %c0_81 = arith.constant 0 : index
    %244 = vector.load %arg11[%c0_79, %c0_80, %c0_81] : memref<2x32x128xf32, #tpu.memory_space<vmem>>, vector<1x32x128xf32>
    %245 = vector.shape_cast %244 : vector<1x32x128xf32> to vector<32x128xf32>
    %cst_82 = arith.constant dense<0.000000e+00> : vector<16x128xf32>
    %246 = tpu.matmul %243, %245, %cst_82 {dimension_numbers = #tpu.dot_dimension_numbers<[1], [0], [0], [1], [0, 0, 1, 1], [], []>} : vector<16x32xf32>, vector<32x128xf32>, vector<16x128xf32> -> vector<16x128xf32>
    %c0_83 = arith.constant 0 : index
    %c0_84 = arith.constant 0 : index
    %c0_85 = arith.constant 0 : index
    %247 = vector.load %arg12[%c0_83, %c0_84, %c0_85] : memref<2x1x128xf32, #tpu.memory_space<vmem>>, vector<1x1x128xf32>
    %248 = vector.shape_cast %247 : vector<1x1x128xf32> to vector<1x128xf32>
    %249 = vector.broadcast %248 : vector<1x128xf32> to vector<16x128xf32>
    %250 = arith.addf %246, %249 : vector<16x128xf32>
    %cst_86 = arith.constant 5.000000e-01 : f32
    %251 = vector.broadcast %cst_86 : f32 to vector<16x128xf32>
    %252 = arith.mulf %251, %250 : vector<16x128xf32>
    %cst_87 = arith.constant 4.471500e-02 : f32
    %253 = vector.broadcast %cst_87 : f32 to vector<16x128xf32>
    %254 = arith.mulf %253, %250 : vector<16x128xf32>
    %255 = arith.mulf %254, %250 : vector<16x128xf32>
    %256 = arith.mulf %255, %250 : vector<16x128xf32>
    %257 = arith.addf %250, %256 : vector<16x128xf32>
    %cst_88 = arith.constant 0.797884583 : f32
    %258 = vector.broadcast %cst_88 : f32 to vector<16x128xf32>
    %259 = arith.mulf %258, %257 : vector<16x128xf32>
    %260 = math.tanh %259 : vector<16x128xf32>
    %cst_89 = arith.constant 1.000000e+00 : f32
    %261 = vector.broadcast %cst_89 : f32 to vector<16x128xf32>
    %262 = arith.addf %261, %260 : vector<16x128xf32>
    %263 = arith.mulf %252, %262 : vector<16x128xf32>
    %c0_90 = arith.constant 0 : index
    %c0_91 = arith.constant 0 : index
    %c0_92 = arith.constant 0 : index
    %264 = vector.load %arg13[%c0_90, %c0_91, %c0_92] : memref<2x128x32xf32, #tpu.memory_space<vmem>>, vector<1x128x32xf32>
    %265 = vector.shape_cast %264 : vector<1x128x32xf32> to vector<128x32xf32>
    %cst_93 = arith.constant dense<0.000000e+00> : vector<16x32xf32>
    %266 = tpu.matmul %263, %265, %cst_93 {dimension_numbers = #tpu.dot_dimension_numbers<[1], [0], [0], [1], [0, 0, 1, 1], [], []>} : vector<16x128xf32>, vector<128x32xf32>, vector<16x32xf32> -> vector<16x32xf32>
    %c0_94 = arith.constant 0 : index
    %c0_95 = arith.constant 0 : index
    %c0_96 = arith.constant 0 : index
    %267 = vector.load %arg14[%c0_94, %c0_95, %c0_96] : memref<2x1x32xf32, #tpu.memory_space<vmem>>, vector<1x1x32xf32>
    %268 = vector.shape_cast %267 : vector<1x1x32xf32> to vector<1x32xf32>
    %269 = vector.broadcast %268 : vector<1x32xf32> to vector<16x32xf32>
    %270 = arith.addf %266, %269 : vector<16x32xf32>
    %271 = arith.addf %243, %270 : vector<16x32xf32>
    %c0_97 = arith.constant 0 : index
    %c0_98 = arith.constant 0 : index
    %c0_99 = arith.constant 0 : index
    %272 = vector.load %arg15[%c0_97, %c0_98, %c0_99] : memref<2x1x32xf32, #tpu.memory_space<vmem>>, vector<1x1x32xf32>
    %273 = vector.shape_cast %272 : vector<1x1x32xf32> to vector<1x32xf32>
    %c0_100 = arith.constant 0 : index
    %c0_101 = arith.constant 0 : index
    %c0_102 = arith.constant 0 : index
    %274 = vector.load %arg16[%c0_100, %c0_101, %c0_102] : memref<2x1x32xf32, #tpu.memory_space<vmem>>, vector<1x1x32xf32>
    %275 = vector.shape_cast %274 : vector<1x1x32xf32> to vector<1x32xf32>
    %cst_103 = arith.constant dense<0.000000e+00> : vector<16xf32>
    %276 = vector.multi_reduction <add>, %271, %cst_103 [1] : vector<16x32xf32> to vector<16xf32>
    %277 = vector.shape_cast %276 : vector<16xf32> to vector<16x1xf32>
    %cst_104 = arith.constant 3.200000e+01 : f32
    %278 = vector.broadcast %cst_104 : f32 to vector<16x1xf32>
    %279 = arith.divf %277, %278 : vector<16x1xf32>
    %280 = vector.broadcast %279 : vector<16x1xf32> to vector<16x32xf32>
    %281 = arith.subf %271, %280 : vector<16x32xf32>
    %282 = arith.mulf %281, %281 : vector<16x32xf32>
    %cst_105 = arith.constant dense<0.000000e+00> : vector<16xf32>
    %283 = vector.multi_reduction <add>, %282, %cst_105 [1] : vector<16x32xf32> to vector<16xf32>
    %284 = vector.shape_cast %283 : vector<16xf32> to vector<16x1xf32>
    %cst_106 = arith.constant 3.200000e+01 : f32
    %285 = vector.broadcast %cst_106 : f32 to vector<16x1xf32>
    %286 = arith.divf %284, %285 : vector<16x1xf32>
    %287 = vector.broadcast %279 : vector<16x1xf32> to vector<16x32xf32>
    %288 = arith.subf %271, %287 : vector<16x32xf32>
    %cst_107 = arith.constant 9.99999996E-13 : f32
    %289 = vector.broadcast %cst_107 : f32 to vector<16x1xf32>
    %290 = arith.addf %286, %289 : vector<16x1xf32>
    %291 = math.rsqrt %290 : vector<16x1xf32>
    %292 = vector.broadcast %291 : vector<16x1xf32> to vector<16x32xf32>
    %293 = arith.mulf %288, %292 : vector<16x32xf32>
    %294 = vector.broadcast %273 : vector<1x32xf32> to vector<16x32xf32>
    %295 = arith.mulf %293, %294 : vector<16x32xf32>
    %296 = vector.broadcast %275 : vector<1x32xf32> to vector<16x32xf32>
    %297 = arith.addf %295, %296 : vector<16x32xf32>
    %c1 = arith.constant 1 : index
    %c0_108 = arith.constant 0 : index
    %c0_109 = arith.constant 0 : index
    %298 = vector.load %arg5[%c1, %c0_108, %c0_109] : memref<2x32x96xf32, #tpu.memory_space<vmem>>, vector<1x32x96xf32>
    %299 = vector.shape_cast %298 : vector<1x32x96xf32> to vector<32x96xf32>
    %c1_110 = arith.constant 1 : index
    %c0_111 = arith.constant 0 : index
    %c0_112 = arith.constant 0 : index
    %300 = vector.load %arg6[%c1_110, %c0_111, %c0_112] : memref<2x1x96xf32, #tpu.memory_space<vmem>>, vector<1x1x96xf32>
    %301 = vector.shape_cast %300 : vector<1x1x96xf32> to vector<1x96xf32>
    %c1_113 = arith.constant 1 : index
    %c0_114 = arith.constant 0 : index
    %c0_115 = arith.constant 0 : index
    %302 = vector.load %arg7[%c1_113, %c0_114, %c0_115] : memref<2x32x32xf32, #tpu.memory_space<vmem>>, vector<1x32x32xf32>
    %303 = vector.shape_cast %302 : vector<1x32x32xf32> to vector<32x32xf32>
    %c1_116 = arith.constant 1 : index
    %c0_117 = arith.constant 0 : index
    %c0_118 = arith.constant 0 : index
    %304 = vector.load %arg8[%c1_116, %c0_117, %c0_118] : memref<2x1x32xf32, #tpu.memory_space<vmem>>, vector<1x1x32xf32>
    %305 = vector.shape_cast %304 : vector<1x1x32xf32> to vector<1x32xf32>
    %cst_119 = arith.constant dense<0.000000e+00> : vector<16x96xf32>
    %306 = tpu.matmul %297, %299, %cst_119 {dimension_numbers = #tpu.dot_dimension_numbers<[1], [0], [0], [1], [0, 0, 1, 1], [], []>} : vector<16x32xf32>, vector<32x96xf32>, vector<16x96xf32> -> vector<16x96xf32>
    %307 = vector.broadcast %301 : vector<1x96xf32> to vector<16x96xf32>
    %308 = arith.addf %306, %307 : vector<16x96xf32>
    %309 = vector.extract_strided_slice %308 {offsets = [0, 0], sizes = [16, 32], strides = [1, 1]} : vector<16x96xf32> to vector<16x32xf32>
    %310 = vector.extract_strided_slice %308 {offsets = [0, 32], sizes = [16, 32], strides = [1, 1]} : vector<16x96xf32> to vector<16x32xf32>
    %311 = vector.extract_strided_slice %308 {offsets = [0, 64], sizes = [16, 32], strides = [1, 1]} : vector<16x96xf32> to vector<16x32xf32>
    %312 = vector.extract_strided_slice %309 {offsets = [0, 0], sizes = [8, 32], strides = [1, 1]} : vector<16x32xf32> to vector<8x32xf32>
    %313 = vector.extract_strided_slice %310 {offsets = [0, 0], sizes = [8, 32], strides = [1, 1]} : vector<16x32xf32> to vector<8x32xf32>
    %314 = vector.extract_strided_slice %311 {offsets = [0, 0], sizes = [8, 32], strides = [1, 1]} : vector<16x32xf32> to vector<8x32xf32>
    %315 = vector.extract_strided_slice %29 {offsets = [0, 0], sizes = [1, 8], strides = [1, 1]} : vector<2x8xf32> to vector<1x8xf32>
    %cst_120 = arith.constant 0.000000e+00 : f32
    %316 = vector.broadcast %cst_120 : f32 to vector<8x32xf32>
    %317 = vector.extract_strided_slice %312 {offsets = [0, 0], sizes = [8, 8], strides = [1, 1]} : vector<8x32xf32> to vector<8x8xf32>
    %318 = vector.extract_strided_slice %313 {offsets = [0, 0], sizes = [8, 8], strides = [1, 1]} : vector<8x32xf32> to vector<8x8xf32>
    %319 = vector.extract_strided_slice %314 {offsets = [0, 0], sizes = [8, 8], strides = [1, 1]} : vector<8x32xf32> to vector<8x8xf32>
    %cst_121 = arith.constant dense<0.000000e+00> : vector<8x8xf32>
    %320 = tpu.matmul %317, %318, %cst_121 {dimension_numbers = #tpu.dot_dimension_numbers<[1], [1], [0], [0], [0, 0, 1, 0], [], []>} : vector<8x8xf32>, vector<8x8xf32>, vector<8x8xf32> -> vector<8x8xf32>
    %321 = vector.broadcast %315 : vector<1x8xf32> to vector<8x8xf32>
    %322 = arith.addf %320, %321 : vector<8x8xf32>
    %cst_122 = arith.constant dense<0xFF800000> : vector<8xf32>
    %323 = vector.multi_reduction <maximumf>, %322, %cst_122 [1] : vector<8x8xf32> to vector<8xf32>
    %324 = vector.shape_cast %323 : vector<8xf32> to vector<8x1xf32>
    %325 = vector.broadcast %324 : vector<8x1xf32> to vector<8x8xf32>
    %326 = arith.subf %322, %325 : vector<8x8xf32>
    %327 = math.exp %326 : vector<8x8xf32>
    %cst_123 = arith.constant dense<0.000000e+00> : vector<8xf32>
    %328 = vector.multi_reduction <add>, %327, %cst_123 [1] : vector<8x8xf32> to vector<8xf32>
    %329 = vector.shape_cast %328 : vector<8xf32> to vector<8x1xf32>
    %330 = tpu.reciprocal %329 {approx = true} : vector<8x1xf32> -> vector<8x1xf32>
    %331 = vector.broadcast %330 : vector<8x1xf32> to vector<8x8xf32>
    %332 = arith.mulf %327, %331 : vector<8x8xf32>
    %cst_124 = arith.constant dense<0.000000e+00> : vector<8x8xf32>
    %333 = tpu.matmul %332, %319, %cst_124 {dimension_numbers = #tpu.dot_dimension_numbers<[1], [0], [0], [1], [0, 0, 1, 1], [], []>} : vector<8x8xf32>, vector<8x8xf32>, vector<8x8xf32> -> vector<8x8xf32>
    %334 = vector.extract_strided_slice %303 {offsets = [0, 0], sizes = [8, 32], strides = [1, 1]} : vector<32x32xf32> to vector<8x32xf32>
    %cst_125 = arith.constant dense<0.000000e+00> : vector<8x32xf32>
    %335 = tpu.matmul %333, %334, %cst_125 {dimension_numbers = #tpu.dot_dimension_numbers<[1], [0], [0], [1], [0, 0, 1, 1], [], []>} : vector<8x8xf32>, vector<8x32xf32>, vector<8x32xf32> -> vector<8x32xf32>
    %336 = arith.addf %316, %335 : vector<8x32xf32>
    %337 = vector.extract_strided_slice %312 {offsets = [0, 8], sizes = [8, 8], strides = [1, 1]} : vector<8x32xf32> to vector<8x8xf32>
    %338 = vector.extract_strided_slice %313 {offsets = [0, 8], sizes = [8, 8], strides = [1, 1]} : vector<8x32xf32> to vector<8x8xf32>
    %339 = vector.extract_strided_slice %314 {offsets = [0, 8], sizes = [8, 8], strides = [1, 1]} : vector<8x32xf32> to vector<8x8xf32>
    %cst_126 = arith.constant dense<0.000000e+00> : vector<8x8xf32>
    %340 = tpu.matmul %337, %338, %cst_126 {dimension_numbers = #tpu.dot_dimension_numbers<[1], [1], [0], [0], [0, 0, 1, 0], [], []>} : vector<8x8xf32>, vector<8x8xf32>, vector<8x8xf32> -> vector<8x8xf32>
    %341 = vector.broadcast %315 : vector<1x8xf32> to vector<8x8xf32>
    %342 = arith.addf %340, %341 : vector<8x8xf32>
    %cst_127 = arith.constant dense<0xFF800000> : vector<8xf32>
    %343 = vector.multi_reduction <maximumf>, %342, %cst_127 [1] : vector<8x8xf32> to vector<8xf32>
    %344 = vector.shape_cast %343 : vector<8xf32> to vector<8x1xf32>
    %345 = vector.broadcast %344 : vector<8x1xf32> to vector<8x8xf32>
    %346 = arith.subf %342, %345 : vector<8x8xf32>
    %347 = math.exp %346 : vector<8x8xf32>
    %cst_128 = arith.constant dense<0.000000e+00> : vector<8xf32>
    %348 = vector.multi_reduction <add>, %347, %cst_128 [1] : vector<8x8xf32> to vector<8xf32>
    %349 = vector.shape_cast %348 : vector<8xf32> to vector<8x1xf32>
    %350 = tpu.reciprocal %349 {approx = true} : vector<8x1xf32> -> vector<8x1xf32>
    %351 = vector.broadcast %350 : vector<8x1xf32> to vector<8x8xf32>
    %352 = arith.mulf %347, %351 : vector<8x8xf32>
    %cst_129 = arith.constant dense<0.000000e+00> : vector<8x8xf32>
    %353 = tpu.matmul %352, %339, %cst_129 {dimension_numbers = #tpu.dot_dimension_numbers<[1], [0], [0], [1], [0, 0, 1, 1], [], []>} : vector<8x8xf32>, vector<8x8xf32>, vector<8x8xf32> -> vector<8x8xf32>
    %354 = vector.extract_strided_slice %303 {offsets = [8, 0], sizes = [8, 32], strides = [1, 1]} : vector<32x32xf32> to vector<8x32xf32>
    %cst_130 = arith.constant dense<0.000000e+00> : vector<8x32xf32>
    %355 = tpu.matmul %353, %354, %cst_130 {dimension_numbers = #tpu.dot_dimension_numbers<[1], [0], [0], [1], [0, 0, 1, 1], [], []>} : vector<8x8xf32>, vector<8x32xf32>, vector<8x32xf32> -> vector<8x32xf32>
    %356 = arith.addf %336, %355 : vector<8x32xf32>
    %357 = vector.extract_strided_slice %312 {offsets = [0, 16], sizes = [8, 8], strides = [1, 1]} : vector<8x32xf32> to vector<8x8xf32>
    %358 = vector.extract_strided_slice %313 {offsets = [0, 16], sizes = [8, 8], strides = [1, 1]} : vector<8x32xf32> to vector<8x8xf32>
    %359 = vector.extract_strided_slice %314 {offsets = [0, 16], sizes = [8, 8], strides = [1, 1]} : vector<8x32xf32> to vector<8x8xf32>
    %cst_131 = arith.constant dense<0.000000e+00> : vector<8x8xf32>
    %360 = tpu.matmul %357, %358, %cst_131 {dimension_numbers = #tpu.dot_dimension_numbers<[1], [1], [0], [0], [0, 0, 1, 0], [], []>} : vector<8x8xf32>, vector<8x8xf32>, vector<8x8xf32> -> vector<8x8xf32>
    %361 = vector.broadcast %315 : vector<1x8xf32> to vector<8x8xf32>
    %362 = arith.addf %360, %361 : vector<8x8xf32>
    %cst_132 = arith.constant dense<0xFF800000> : vector<8xf32>
    %363 = vector.multi_reduction <maximumf>, %362, %cst_132 [1] : vector<8x8xf32> to vector<8xf32>
    %364 = vector.shape_cast %363 : vector<8xf32> to vector<8x1xf32>
    %365 = vector.broadcast %364 : vector<8x1xf32> to vector<8x8xf32>
    %366 = arith.subf %362, %365 : vector<8x8xf32>
    %367 = math.exp %366 : vector<8x8xf32>
    %cst_133 = arith.constant dense<0.000000e+00> : vector<8xf32>
    %368 = vector.multi_reduction <add>, %367, %cst_133 [1] : vector<8x8xf32> to vector<8xf32>
    %369 = vector.shape_cast %368 : vector<8xf32> to vector<8x1xf32>
    %370 = tpu.reciprocal %369 {approx = true} : vector<8x1xf32> -> vector<8x1xf32>
    %371 = vector.broadcast %370 : vector<8x1xf32> to vector<8x8xf32>
    %372 = arith.mulf %367, %371 : vector<8x8xf32>
    %cst_134 = arith.constant dense<0.000000e+00> : vector<8x8xf32>
    %373 = tpu.matmul %372, %359, %cst_134 {dimension_numbers = #tpu.dot_dimension_numbers<[1], [0], [0], [1], [0, 0, 1, 1], [], []>} : vector<8x8xf32>, vector<8x8xf32>, vector<8x8xf32> -> vector<8x8xf32>
    %374 = vector.extract_strided_slice %303 {offsets = [16, 0], sizes = [8, 32], strides = [1, 1]} : vector<32x32xf32> to vector<8x32xf32>
    %cst_135 = arith.constant dense<0.000000e+00> : vector<8x32xf32>
    %375 = tpu.matmul %373, %374, %cst_135 {dimension_numbers = #tpu.dot_dimension_numbers<[1], [0], [0], [1], [0, 0, 1, 1], [], []>} : vector<8x8xf32>, vector<8x32xf32>, vector<8x32xf32> -> vector<8x32xf32>
    %376 = arith.addf %356, %375 : vector<8x32xf32>
    %377 = vector.extract_strided_slice %312 {offsets = [0, 24], sizes = [8, 8], strides = [1, 1]} : vector<8x32xf32> to vector<8x8xf32>
    %378 = vector.extract_strided_slice %313 {offsets = [0, 24], sizes = [8, 8], strides = [1, 1]} : vector<8x32xf32> to vector<8x8xf32>
    %379 = vector.extract_strided_slice %314 {offsets = [0, 24], sizes = [8, 8], strides = [1, 1]} : vector<8x32xf32> to vector<8x8xf32>
    %cst_136 = arith.constant dense<0.000000e+00> : vector<8x8xf32>
    %380 = tpu.matmul %377, %378, %cst_136 {dimension_numbers = #tpu.dot_dimension_numbers<[1], [1], [0], [0], [0, 0, 1, 0], [], []>} : vector<8x8xf32>, vector<8x8xf32>, vector<8x8xf32> -> vector<8x8xf32>
    %381 = vector.broadcast %315 : vector<1x8xf32> to vector<8x8xf32>
    %382 = arith.addf %380, %381 : vector<8x8xf32>
    %cst_137 = arith.constant dense<0xFF800000> : vector<8xf32>
    %383 = vector.multi_reduction <maximumf>, %382, %cst_137 [1] : vector<8x8xf32> to vector<8xf32>
    %384 = vector.shape_cast %383 : vector<8xf32> to vector<8x1xf32>
    %385 = vector.broadcast %384 : vector<8x1xf32> to vector<8x8xf32>
    %386 = arith.subf %382, %385 : vector<8x8xf32>
    %387 = math.exp %386 : vector<8x8xf32>
    %cst_138 = arith.constant dense<0.000000e+00> : vector<8xf32>
    %388 = vector.multi_reduction <add>, %387, %cst_138 [1] : vector<8x8xf32> to vector<8xf32>
    %389 = vector.shape_cast %388 : vector<8xf32> to vector<8x1xf32>
    %390 = tpu.reciprocal %389 {approx = true} : vector<8x1xf32> -> vector<8x1xf32>
    %391 = vector.broadcast %390 : vector<8x1xf32> to vector<8x8xf32>
    %392 = arith.mulf %387, %391 : vector<8x8xf32>
    %cst_139 = arith.constant dense<0.000000e+00> : vector<8x8xf32>
    %393 = tpu.matmul %392, %379, %cst_139 {dimension_numbers = #tpu.dot_dimension_numbers<[1], [0], [0], [1], [0, 0, 1, 1], [], []>} : vector<8x8xf32>, vector<8x8xf32>, vector<8x8xf32> -> vector<8x8xf32>
    %394 = vector.extract_strided_slice %303 {offsets = [24, 0], sizes = [8, 32], strides = [1, 1]} : vector<32x32xf32> to vector<8x32xf32>
    %cst_140 = arith.constant dense<0.000000e+00> : vector<8x32xf32>
    %395 = tpu.matmul %393, %394, %cst_140 {dimension_numbers = #tpu.dot_dimension_numbers<[1], [0], [0], [1], [0, 0, 1, 1], [], []>} : vector<8x8xf32>, vector<8x32xf32>, vector<8x32xf32> -> vector<8x32xf32>
    %396 = arith.addf %376, %395 : vector<8x32xf32>
    %397 = vector.extract_strided_slice %309 {offsets = [8, 0], sizes = [8, 32], strides = [1, 1]} : vector<16x32xf32> to vector<8x32xf32>
    %398 = vector.extract_strided_slice %310 {offsets = [8, 0], sizes = [8, 32], strides = [1, 1]} : vector<16x32xf32> to vector<8x32xf32>
    %399 = vector.extract_strided_slice %311 {offsets = [8, 0], sizes = [8, 32], strides = [1, 1]} : vector<16x32xf32> to vector<8x32xf32>
    %400 = vector.extract_strided_slice %29 {offsets = [1, 0], sizes = [1, 8], strides = [1, 1]} : vector<2x8xf32> to vector<1x8xf32>
    %cst_141 = arith.constant 0.000000e+00 : f32
    %401 = vector.broadcast %cst_141 : f32 to vector<8x32xf32>
    %402 = vector.extract_strided_slice %397 {offsets = [0, 0], sizes = [8, 8], strides = [1, 1]} : vector<8x32xf32> to vector<8x8xf32>
    %403 = vector.extract_strided_slice %398 {offsets = [0, 0], sizes = [8, 8], strides = [1, 1]} : vector<8x32xf32> to vector<8x8xf32>
    %404 = vector.extract_strided_slice %399 {offsets = [0, 0], sizes = [8, 8], strides = [1, 1]} : vector<8x32xf32> to vector<8x8xf32>
    %cst_142 = arith.constant dense<0.000000e+00> : vector<8x8xf32>
    %405 = tpu.matmul %402, %403, %cst_142 {dimension_numbers = #tpu.dot_dimension_numbers<[1], [1], [0], [0], [0, 0, 1, 0], [], []>} : vector<8x8xf32>, vector<8x8xf32>, vector<8x8xf32> -> vector<8x8xf32>
    %406 = vector.broadcast %400 : vector<1x8xf32> to vector<8x8xf32>
    %407 = arith.addf %405, %406 : vector<8x8xf32>
    %cst_143 = arith.constant dense<0xFF800000> : vector<8xf32>
    %408 = vector.multi_reduction <maximumf>, %407, %cst_143 [1] : vector<8x8xf32> to vector<8xf32>
    %409 = vector.shape_cast %408 : vector<8xf32> to vector<8x1xf32>
    %410 = vector.broadcast %409 : vector<8x1xf32> to vector<8x8xf32>
    %411 = arith.subf %407, %410 : vector<8x8xf32>
    %412 = math.exp %411 : vector<8x8xf32>
    %cst_144 = arith.constant dense<0.000000e+00> : vector<8xf32>
    %413 = vector.multi_reduction <add>, %412, %cst_144 [1] : vector<8x8xf32> to vector<8xf32>
    %414 = vector.shape_cast %413 : vector<8xf32> to vector<8x1xf32>
    %415 = tpu.reciprocal %414 {approx = true} : vector<8x1xf32> -> vector<8x1xf32>
    %416 = vector.broadcast %415 : vector<8x1xf32> to vector<8x8xf32>
    %417 = arith.mulf %412, %416 : vector<8x8xf32>
    %cst_145 = arith.constant dense<0.000000e+00> : vector<8x8xf32>
    %418 = tpu.matmul %417, %404, %cst_145 {dimension_numbers = #tpu.dot_dimension_numbers<[1], [0], [0], [1], [0, 0, 1, 1], [], []>} : vector<8x8xf32>, vector<8x8xf32>, vector<8x8xf32> -> vector<8x8xf32>
    %419 = vector.extract_strided_slice %303 {offsets = [0, 0], sizes = [8, 32], strides = [1, 1]} : vector<32x32xf32> to vector<8x32xf32>
    %cst_146 = arith.constant dense<0.000000e+00> : vector<8x32xf32>
    %420 = tpu.matmul %418, %419, %cst_146 {dimension_numbers = #tpu.dot_dimension_numbers<[1], [0], [0], [1], [0, 0, 1, 1], [], []>} : vector<8x8xf32>, vector<8x32xf32>, vector<8x32xf32> -> vector<8x32xf32>
    %421 = arith.addf %401, %420 : vector<8x32xf32>
    %422 = vector.extract_strided_slice %397 {offsets = [0, 8], sizes = [8, 8], strides = [1, 1]} : vector<8x32xf32> to vector<8x8xf32>
    %423 = vector.extract_strided_slice %398 {offsets = [0, 8], sizes = [8, 8], strides = [1, 1]} : vector<8x32xf32> to vector<8x8xf32>
    %424 = vector.extract_strided_slice %399 {offsets = [0, 8], sizes = [8, 8], strides = [1, 1]} : vector<8x32xf32> to vector<8x8xf32>
    %cst_147 = arith.constant dense<0.000000e+00> : vector<8x8xf32>
    %425 = tpu.matmul %422, %423, %cst_147 {dimension_numbers = #tpu.dot_dimension_numbers<[1], [1], [0], [0], [0, 0, 1, 0], [], []>} : vector<8x8xf32>, vector<8x8xf32>, vector<8x8xf32> -> vector<8x8xf32>
    %426 = vector.broadcast %400 : vector<1x8xf32> to vector<8x8xf32>
    %427 = arith.addf %425, %426 : vector<8x8xf32>
    %cst_148 = arith.constant dense<0xFF800000> : vector<8xf32>
    %428 = vector.multi_reduction <maximumf>, %427, %cst_148 [1] : vector<8x8xf32> to vector<8xf32>
    %429 = vector.shape_cast %428 : vector<8xf32> to vector<8x1xf32>
    %430 = vector.broadcast %429 : vector<8x1xf32> to vector<8x8xf32>
    %431 = arith.subf %427, %430 : vector<8x8xf32>
    %432 = math.exp %431 : vector<8x8xf32>
    %cst_149 = arith.constant dense<0.000000e+00> : vector<8xf32>
    %433 = vector.multi_reduction <add>, %432, %cst_149 [1] : vector<8x8xf32> to vector<8xf32>
    %434 = vector.shape_cast %433 : vector<8xf32> to vector<8x1xf32>
    %435 = tpu.reciprocal %434 {approx = true} : vector<8x1xf32> -> vector<8x1xf32>
    %436 = vector.broadcast %435 : vector<8x1xf32> to vector<8x8xf32>
    %437 = arith.mulf %432, %436 : vector<8x8xf32>
    %cst_150 = arith.constant dense<0.000000e+00> : vector<8x8xf32>
    %438 = tpu.matmul %437, %424, %cst_150 {dimension_numbers = #tpu.dot_dimension_numbers<[1], [0], [0], [1], [0, 0, 1, 1], [], []>} : vector<8x8xf32>, vector<8x8xf32>, vector<8x8xf32> -> vector<8x8xf32>
    %439 = vector.extract_strided_slice %303 {offsets = [8, 0], sizes = [8, 32], strides = [1, 1]} : vector<32x32xf32> to vector<8x32xf32>
    %cst_151 = arith.constant dense<0.000000e+00> : vector<8x32xf32>
    %440 = tpu.matmul %438, %439, %cst_151 {dimension_numbers = #tpu.dot_dimension_numbers<[1], [0], [0], [1], [0, 0, 1, 1], [], []>} : vector<8x8xf32>, vector<8x32xf32>, vector<8x32xf32> -> vector<8x32xf32>
    %441 = arith.addf %421, %440 : vector<8x32xf32>
    %442 = vector.extract_strided_slice %397 {offsets = [0, 16], sizes = [8, 8], strides = [1, 1]} : vector<8x32xf32> to vector<8x8xf32>
    %443 = vector.extract_strided_slice %398 {offsets = [0, 16], sizes = [8, 8], strides = [1, 1]} : vector<8x32xf32> to vector<8x8xf32>
    %444 = vector.extract_strided_slice %399 {offsets = [0, 16], sizes = [8, 8], strides = [1, 1]} : vector<8x32xf32> to vector<8x8xf32>
    %cst_152 = arith.constant dense<0.000000e+00> : vector<8x8xf32>
    %445 = tpu.matmul %442, %443, %cst_152 {dimension_numbers = #tpu.dot_dimension_numbers<[1], [1], [0], [0], [0, 0, 1, 0], [], []>} : vector<8x8xf32>, vector<8x8xf32>, vector<8x8xf32> -> vector<8x8xf32>
    %446 = vector.broadcast %400 : vector<1x8xf32> to vector<8x8xf32>
    %447 = arith.addf %445, %446 : vector<8x8xf32>
    %cst_153 = arith.constant dense<0xFF800000> : vector<8xf32>
    %448 = vector.multi_reduction <maximumf>, %447, %cst_153 [1] : vector<8x8xf32> to vector<8xf32>
    %449 = vector.shape_cast %448 : vector<8xf32> to vector<8x1xf32>
    %450 = vector.broadcast %449 : vector<8x1xf32> to vector<8x8xf32>
    %451 = arith.subf %447, %450 : vector<8x8xf32>
    %452 = math.exp %451 : vector<8x8xf32>
    %cst_154 = arith.constant dense<0.000000e+00> : vector<8xf32>
    %453 = vector.multi_reduction <add>, %452, %cst_154 [1] : vector<8x8xf32> to vector<8xf32>
    %454 = vector.shape_cast %453 : vector<8xf32> to vector<8x1xf32>
    %455 = tpu.reciprocal %454 {approx = true} : vector<8x1xf32> -> vector<8x1xf32>
    %456 = vector.broadcast %455 : vector<8x1xf32> to vector<8x8xf32>
    %457 = arith.mulf %452, %456 : vector<8x8xf32>
    %cst_155 = arith.constant dense<0.000000e+00> : vector<8x8xf32>
    %458 = tpu.matmul %457, %444, %cst_155 {dimension_numbers = #tpu.dot_dimension_numbers<[1], [0], [0], [1], [0, 0, 1, 1], [], []>} : vector<8x8xf32>, vector<8x8xf32>, vector<8x8xf32> -> vector<8x8xf32>
    %459 = vector.extract_strided_slice %303 {offsets = [16, 0], sizes = [8, 32], strides = [1, 1]} : vector<32x32xf32> to vector<8x32xf32>
    %cst_156 = arith.constant dense<0.000000e+00> : vector<8x32xf32>
    %460 = tpu.matmul %458, %459, %cst_156 {dimension_numbers = #tpu.dot_dimension_numbers<[1], [0], [0], [1], [0, 0, 1, 1], [], []>} : vector<8x8xf32>, vector<8x32xf32>, vector<8x32xf32> -> vector<8x32xf32>
    %461 = arith.addf %441, %460 : vector<8x32xf32>
    %462 = vector.extract_strided_slice %397 {offsets = [0, 24], sizes = [8, 8], strides = [1, 1]} : vector<8x32xf32> to vector<8x8xf32>
    %463 = vector.extract_strided_slice %398 {offsets = [0, 24], sizes = [8, 8], strides = [1, 1]} : vector<8x32xf32> to vector<8x8xf32>
    %464 = vector.extract_strided_slice %399 {offsets = [0, 24], sizes = [8, 8], strides = [1, 1]} : vector<8x32xf32> to vector<8x8xf32>
    %cst_157 = arith.constant dense<0.000000e+00> : vector<8x8xf32>
    %465 = tpu.matmul %462, %463, %cst_157 {dimension_numbers = #tpu.dot_dimension_numbers<[1], [1], [0], [0], [0, 0, 1, 0], [], []>} : vector<8x8xf32>, vector<8x8xf32>, vector<8x8xf32> -> vector<8x8xf32>
    %466 = vector.broadcast %400 : vector<1x8xf32> to vector<8x8xf32>
    %467 = arith.addf %465, %466 : vector<8x8xf32>
    %cst_158 = arith.constant dense<0xFF800000> : vector<8xf32>
    %468 = vector.multi_reduction <maximumf>, %467, %cst_158 [1] : vector<8x8xf32> to vector<8xf32>
    %469 = vector.shape_cast %468 : vector<8xf32> to vector<8x1xf32>
    %470 = vector.broadcast %469 : vector<8x1xf32> to vector<8x8xf32>
    %471 = arith.subf %467, %470 : vector<8x8xf32>
    %472 = math.exp %471 : vector<8x8xf32>
    %cst_159 = arith.constant dense<0.000000e+00> : vector<8xf32>
    %473 = vector.multi_reduction <add>, %472, %cst_159 [1] : vector<8x8xf32> to vector<8xf32>
    %474 = vector.shape_cast %473 : vector<8xf32> to vector<8x1xf32>
    %475 = tpu.reciprocal %474 {approx = true} : vector<8x1xf32> -> vector<8x1xf32>
    %476 = vector.broadcast %475 : vector<8x1xf32> to vector<8x8xf32>
    %477 = arith.mulf %472, %476 : vector<8x8xf32>
    %cst_160 = arith.constant dense<0.000000e+00> : vector<8x8xf32>
    %478 = tpu.matmul %477, %464, %cst_160 {dimension_numbers = #tpu.dot_dimension_numbers<[1], [0], [0], [1], [0, 0, 1, 1], [], []>} : vector<8x8xf32>, vector<8x8xf32>, vector<8x8xf32> -> vector<8x8xf32>
    %479 = vector.extract_strided_slice %303 {offsets = [24, 0], sizes = [8, 32], strides = [1, 1]} : vector<32x32xf32> to vector<8x32xf32>
    %cst_161 = arith.constant dense<0.000000e+00> : vector<8x32xf32>
    %480 = tpu.matmul %478, %479, %cst_161 {dimension_numbers = #tpu.dot_dimension_numbers<[1], [0], [0], [1], [0, 0, 1, 1], [], []>} : vector<8x8xf32>, vector<8x32xf32>, vector<8x32xf32> -> vector<8x32xf32>
    %481 = arith.addf %461, %480 : vector<8x32xf32>
    %482 = tpu.concatenate %396, %481 in 0 : vector<8x32xf32>, vector<8x32xf32> -> vector<16x32xf32>
    %483 = vector.broadcast %305 : vector<1x32xf32> to vector<16x32xf32>
    %484 = arith.addf %482, %483 : vector<16x32xf32>
    %485 = arith.addf %297, %484 : vector<16x32xf32>
    %c1_162 = arith.constant 1 : index
    %c0_163 = arith.constant 0 : index
    %c0_164 = arith.constant 0 : index
    %486 = vector.load %arg9[%c1_162, %c0_163, %c0_164] : memref<2x1x32xf32, #tpu.memory_space<vmem>>, vector<1x1x32xf32>
    %487 = vector.shape_cast %486 : vector<1x1x32xf32> to vector<1x32xf32>
    %c1_165 = arith.constant 1 : index
    %c0_166 = arith.constant 0 : index
    %c0_167 = arith.constant 0 : index
    %488 = vector.load %arg10[%c1_165, %c0_166, %c0_167] : memref<2x1x32xf32, #tpu.memory_space<vmem>>, vector<1x1x32xf32>
    %489 = vector.shape_cast %488 : vector<1x1x32xf32> to vector<1x32xf32>
    %cst_168 = arith.constant dense<0.000000e+00> : vector<16xf32>
    %490 = vector.multi_reduction <add>, %485, %cst_168 [1] : vector<16x32xf32> to vector<16xf32>
    %491 = vector.shape_cast %490 : vector<16xf32> to vector<16x1xf32>
    %cst_169 = arith.constant 3.200000e+01 : f32
    %492 = vector.broadcast %cst_169 : f32 to vector<16x1xf32>
    %493 = arith.divf %491, %492 : vector<16x1xf32>
    %494 = vector.broadcast %493 : vector<16x1xf32> to vector<16x32xf32>
    %495 = arith.subf %485, %494 : vector<16x32xf32>
    %496 = arith.mulf %495, %495 : vector<16x32xf32>
    %cst_170 = arith.constant dense<0.000000e+00> : vector<16xf32>
    %497 = vector.multi_reduction <add>, %496, %cst_170 [1] : vector<16x32xf32> to vector<16xf32>
    %498 = vector.shape_cast %497 : vector<16xf32> to vector<16x1xf32>
    %cst_171 = arith.constant 3.200000e+01 : f32
    %499 = vector.broadcast %cst_171 : f32 to vector<16x1xf32>
    %500 = arith.divf %498, %499 : vector<16x1xf32>
    %501 = vector.broadcast %493 : vector<16x1xf32> to vector<16x32xf32>
    %502 = arith.subf %485, %501 : vector<16x32xf32>
    %cst_172 = arith.constant 9.99999996E-13 : f32
    %503 = vector.broadcast %cst_172 : f32 to vector<16x1xf32>
    %504 = arith.addf %500, %503 : vector<16x1xf32>
    %505 = math.rsqrt %504 : vector<16x1xf32>
    %506 = vector.broadcast %505 : vector<16x1xf32> to vector<16x32xf32>
    %507 = arith.mulf %502, %506 : vector<16x32xf32>
    %508 = vector.broadcast %487 : vector<1x32xf32> to vector<16x32xf32>
    %509 = arith.mulf %507, %508 : vector<16x32xf32>
    %510 = vector.broadcast %489 : vector<1x32xf32> to vector<16x32xf32>
    %511 = arith.addf %509, %510 : vector<16x32xf32>
    %c1_173 = arith.constant 1 : index
    %c0_174 = arith.constant 0 : index
    %c0_175 = arith.constant 0 : index
    %512 = vector.load %arg11[%c1_173, %c0_174, %c0_175] : memref<2x32x128xf32, #tpu.memory_space<vmem>>, vector<1x32x128xf32>
    %513 = vector.shape_cast %512 : vector<1x32x128xf32> to vector<32x128xf32>
    %cst_176 = arith.constant dense<0.000000e+00> : vector<16x128xf32>
    %514 = tpu.matmul %511, %513, %cst_176 {dimension_numbers = #tpu.dot_dimension_numbers<[1], [0], [0], [1], [0, 0, 1, 1], [], []>} : vector<16x32xf32>, vector<32x128xf32>, vector<16x128xf32> -> vector<16x128xf32>
    %c1_177 = arith.constant 1 : index
    %c0_178 = arith.constant 0 : index
    %c0_179 = arith.constant 0 : index
    %515 = vector.load %arg12[%c1_177, %c0_178, %c0_179] : memref<2x1x128xf32, #tpu.memory_space<vmem>>, vector<1x1x128xf32>
    %516 = vector.shape_cast %515 : vector<1x1x128xf32> to vector<1x128xf32>
    %517 = vector.broadcast %516 : vector<1x128xf32> to vector<16x128xf32>
    %518 = arith.addf %514, %517 : vector<16x128xf32>
    %cst_180 = arith.constant 5.000000e-01 : f32
    %519 = vector.broadcast %cst_180 : f32 to vector<16x128xf32>
    %520 = arith.mulf %519, %518 : vector<16x128xf32>
    %cst_181 = arith.constant 4.471500e-02 : f32
    %521 = vector.broadcast %cst_181 : f32 to vector<16x128xf32>
    %522 = arith.mulf %521, %518 : vector<16x128xf32>
    %523 = arith.mulf %522, %518 : vector<16x128xf32>
    %524 = arith.mulf %523, %518 : vector<16x128xf32>
    %525 = arith.addf %518, %524 : vector<16x128xf32>
    %cst_182 = arith.constant 0.797884583 : f32
    %526 = vector.broadcast %cst_182 : f32 to vector<16x128xf32>
    %527 = arith.mulf %526, %525 : vector<16x128xf32>
    %528 = math.tanh %527 : vector<16x128xf32>
    %cst_183 = arith.constant 1.000000e+00 : f32
    %529 = vector.broadcast %cst_183 : f32 to vector<16x128xf32>
    %530 = arith.addf %529, %528 : vector<16x128xf32>
    %531 = arith.mulf %520, %530 : vector<16x128xf32>
    %c1_184 = arith.constant 1 : index
    %c0_185 = arith.constant 0 : index
    %c0_186 = arith.constant 0 : index
    %532 = vector.load %arg13[%c1_184, %c0_185, %c0_186] : memref<2x128x32xf32, #tpu.memory_space<vmem>>, vector<1x128x32xf32>
    %533 = vector.shape_cast %532 : vector<1x128x32xf32> to vector<128x32xf32>
    %cst_187 = arith.constant dense<0.000000e+00> : vector<16x32xf32>
    %534 = tpu.matmul %531, %533, %cst_187 {dimension_numbers = #tpu.dot_dimension_numbers<[1], [0], [0], [1], [0, 0, 1, 1], [], []>} : vector<16x128xf32>, vector<128x32xf32>, vector<16x32xf32> -> vector<16x32xf32>
    %c1_188 = arith.constant 1 : index
    %c0_189 = arith.constant 0 : index
    %c0_190 = arith.constant 0 : index
    %535 = vector.load %arg14[%c1_188, %c0_189, %c0_190] : memref<2x1x32xf32, #tpu.memory_space<vmem>>, vector<1x1x32xf32>
    %536 = vector.shape_cast %535 : vector<1x1x32xf32> to vector<1x32xf32>
    %537 = vector.broadcast %536 : vector<1x32xf32> to vector<16x32xf32>
    %538 = arith.addf %534, %537 : vector<16x32xf32>
    %539 = arith.addf %511, %538 : vector<16x32xf32>
    %c1_191 = arith.constant 1 : index
    %c0_192 = arith.constant 0 : index
    %c0_193 = arith.constant 0 : index
    %540 = vector.load %arg15[%c1_191, %c0_192, %c0_193] : memref<2x1x32xf32, #tpu.memory_space<vmem>>, vector<1x1x32xf32>
    %541 = vector.shape_cast %540 : vector<1x1x32xf32> to vector<1x32xf32>
    %c1_194 = arith.constant 1 : index
    %c0_195 = arith.constant 0 : index
    %c0_196 = arith.constant 0 : index
    %542 = vector.load %arg16[%c1_194, %c0_195, %c0_196] : memref<2x1x32xf32, #tpu.memory_space<vmem>>, vector<1x1x32xf32>
    %543 = vector.shape_cast %542 : vector<1x1x32xf32> to vector<1x32xf32>
    %cst_197 = arith.constant dense<0.000000e+00> : vector<16xf32>
    %544 = vector.multi_reduction <add>, %539, %cst_197 [1] : vector<16x32xf32> to vector<16xf32>
    %545 = vector.shape_cast %544 : vector<16xf32> to vector<16x1xf32>
    %cst_198 = arith.constant 3.200000e+01 : f32
    %546 = vector.broadcast %cst_198 : f32 to vector<16x1xf32>
    %547 = arith.divf %545, %546 : vector<16x1xf32>
    %548 = vector.broadcast %547 : vector<16x1xf32> to vector<16x32xf32>
    %549 = arith.subf %539, %548 : vector<16x32xf32>
    %550 = arith.mulf %549, %549 : vector<16x32xf32>
    %cst_199 = arith.constant dense<0.000000e+00> : vector<16xf32>
    %551 = vector.multi_reduction <add>, %550, %cst_199 [1] : vector<16x32xf32> to vector<16xf32>
    %552 = vector.shape_cast %551 : vector<16xf32> to vector<16x1xf32>
    %cst_200 = arith.constant 3.200000e+01 : f32
    %553 = vector.broadcast %cst_200 : f32 to vector<16x1xf32>
    %554 = arith.divf %552, %553 : vector<16x1xf32>
    %555 = vector.broadcast %547 : vector<16x1xf32> to vector<16x32xf32>
    %556 = arith.subf %539, %555 : vector<16x32xf32>
    %cst_201 = arith.constant 9.99999996E-13 : f32
    %557 = vector.broadcast %cst_201 : f32 to vector<16x1xf32>
    %558 = arith.addf %554, %557 : vector<16x1xf32>
    %559 = math.rsqrt %558 : vector<16x1xf32>
    %560 = vector.broadcast %559 : vector<16x1xf32> to vector<16x32xf32>
    %561 = arith.mulf %556, %560 : vector<16x32xf32>
    %562 = vector.broadcast %541 : vector<1x32xf32> to vector<16x32xf32>
    %563 = arith.mulf %561, %562 : vector<16x32xf32>
    %564 = vector.broadcast %543 : vector<1x32xf32> to vector<16x32xf32>
    %565 = arith.addf %563, %564 : vector<16x32xf32>
    %c0_202 = arith.constant 0 : index
    %c0_203 = arith.constant 0 : index
    %566 = vector.load %arg2[%c0_202, %c0_203] : memref<16x1xf32, #tpu.memory_space<vmem>>, vector<16x1xf32>
    %567 = vector.broadcast %566 : vector<16x1xf32> to vector<16x32xf32>
    %568 = arith.mulf %565, %567 : vector<16x32xf32>
    %569 = vector.extract_strided_slice %568 {offsets = [0, 0], sizes = [8, 32], strides = [1, 1]} : vector<16x32xf32> to vector<8x32xf32>
    %cst_204 = arith.constant dense<0.000000e+00> : vector<32xf32>
    %570 = vector.multi_reduction <add>, %569, %cst_204 [0] : vector<8x32xf32> to vector<32xf32>
    %571 = vector.shape_cast %570 : vector<32xf32> to vector<1x32xf32>
    %572 = vector.extract_strided_slice %566 {offsets = [0, 0], sizes = [8, 1], strides = [1, 1]} : vector<16x1xf32> to vector<8x1xf32>
    %cst_205 = arith.constant dense<0.000000e+00> : vector<1xf32>
    %573 = vector.multi_reduction <add>, %572, %cst_205 [0] : vector<8x1xf32> to vector<1xf32>
    %574 = vector.shape_cast %573 : vector<1xf32> to vector<1x1xf32>
    %cst_206 = arith.constant 9.99999971E-10 : f32
    %575 = vector.broadcast %cst_206 : f32 to vector<1x1xf32>
    %576 = arith.maximumf %574, %575 : vector<1x1xf32>
    %577 = tpu.reciprocal %576 {approx = true} : vector<1x1xf32> -> vector<1x1xf32>
    %578 = vector.broadcast %577 : vector<1x1xf32> to vector<1x32xf32>
    %579 = arith.mulf %571, %578 : vector<1x32xf32>
    %580 = vector.extract_strided_slice %568 {offsets = [8, 0], sizes = [8, 32], strides = [1, 1]} : vector<16x32xf32> to vector<8x32xf32>
    %cst_207 = arith.constant dense<0.000000e+00> : vector<32xf32>
    %581 = vector.multi_reduction <add>, %580, %cst_207 [0] : vector<8x32xf32> to vector<32xf32>
    %582 = vector.shape_cast %581 : vector<32xf32> to vector<1x32xf32>
    %583 = vector.extract_strided_slice %566 {offsets = [8, 0], sizes = [8, 1], strides = [1, 1]} : vector<16x1xf32> to vector<8x1xf32>
    %cst_208 = arith.constant dense<0.000000e+00> : vector<1xf32>
    %584 = vector.multi_reduction <add>, %583, %cst_208 [0] : vector<8x1xf32> to vector<1xf32>
    %585 = vector.shape_cast %584 : vector<1xf32> to vector<1x1xf32>
    %cst_209 = arith.constant 9.99999971E-10 : f32
    %586 = vector.broadcast %cst_209 : f32 to vector<1x1xf32>
    %587 = arith.maximumf %585, %586 : vector<1x1xf32>
    %588 = tpu.reciprocal %587 {approx = true} : vector<1x1xf32> -> vector<1x1xf32>
    %589 = vector.broadcast %588 : vector<1x1xf32> to vector<1x32xf32>
    %590 = arith.mulf %582, %589 : vector<1x32xf32>
    %591 = tpu.concatenate %579, %590 in 0 : vector<1x32xf32>, vector<1x32xf32> -> vector<2x32xf32>
    %c0_210 = arith.constant 0 : index
    %c0_211 = arith.constant 0 : index
    %592 = vector.load %arg17[%c0_210, %c0_211] : memref<2x32xf32, #tpu.memory_space<vmem>>, vector<2x32xf32>
    tpu.vector_store %arg17[%c0_210, %c0_211], %591 {strides = array<i32>} : memref<2x32xf32, #tpu.memory_space<vmem>>, vector<2x32xf32>,
    return
  }
}

</mosaic_0001>

<bundles_post_ra>
// kernel: transformer_encoder_forward.1
= control target key start
LH: loop header
LB: loop body
LE: loop exit
PB: predicated region body
PF: predicated region fallthrough
CT: control target
= control target key end

     0   :  { %s3119_s0 = inlined_call_operand.vmem [shape: f32[16,32], index: 0, kind: input, shape index: {}]   ;;  %s3120_s1 = inlined_call_operand.vmem [shape: f32[2,8], index: 1, kind: input, shape index: {}]   ;;  %s3121_s2 = inlined_call_operand.vmem [shape: f32[16,1], index: 2, kind: input, shape index: {}]   ;;  %s3122_s3 = inlined_call_operand.vmem [shape: f32[1,32], index: 3, kind: input, shape index: {}]   ;;  %s3123_s4 = inlined_call_operand.vmem [shape: f32[1,32], index: 4, kind: input, shape index: {}]   ;;  %s3124_s5 = inlined_call_operand.vmem [shape: f32[2,32,96], index: 5, kind: input, shape index: {}]   ;;  %s3125_s6 = inlined_call_operand.vmem [shape: f32[2,1,96], index: 6, kind: input, shape index: {}]   ;;  %s3126_s7 = inlined_call_operand.vmem [shape: f32[2,32,32], index: 7, kind: input, shape index: {}]   ;;  %s3127_s8 = inlined_call_operand.vmem [shape: f32[2,1,32], index: 8, kind: input, shape index: {}]   ;;  %s3128_s9 = inlined_call_operand.vmem [shape: f32[2,1,32], index: 9, kind: input, shape index: {}]   ;;  %s3129_s10 = inlined_call_operand.vmem [shape: f32[2,1,32], index: 10, kind: input, shape index: {}]   ;;  %s3130_s11 = inlined_call_operand.vmem [shape: f32[2,32,128], index: 11, kind: input, shape index: {}]   ;;  %s3131_s12 = inlined_call_operand.vmem [shape: f32[2,1,128], index: 12, kind: input, shape index: {}]   ;;  %s3132_s13 = inlined_call_operand.vmem [shape: f32[2,128,32], index: 13, kind: input, shape index: {}]   ;;  %s3133_s14 = inlined_call_operand.vmem [shape: f32[2,1,32], index: 14, kind: input, shape index: {}]   ;;  %s3134_s15 = inlined_call_operand.vmem [shape: f32[2,1,32], index: 15, kind: input, shape index: {}]   ;;  %s3135_s16 = inlined_call_operand.vmem [shape: f32[2,1,32], index: 16, kind: input, shape index: {}]   ;;  %s3136_s17 = inlined_call_operand.hbm [shape: f32[2,32], index: 17, kind: output, shape index: {}]  }
   0x1   :  { %3146 = sst [smem:[#allocation5_spill]] %s3119_s0 }
   0x2   :  { %3147 = sst [smem:[#allocation6_spill]] %s3120_s1 }
   0x3   :  { %s3148_s26 = sld [smem:[#allocation5_spill]]  ;;  %vm61_vm0 = vcmask 261120  }
   0x9   :  { %v57_v0 = vld [vmem:[%s3148_s26] sm:$0xff] }
   0xa   :  { %v62_v1 = vsel %vm61_vm0, %v57_v0, 0.0 }
   0xb   :  { %63 = vadd.xlane.f32.xlu0 %v62_v1 }
   0xc   :  { %22 = vsyncpa [#allocation3], 0  ;;  %v2421_v2 = vmov 32.0   ;;  %v129_v14 = vld [vmem:[%s3124_s5 + $0x18] sm:$0xff]  ;;  %v128_v15 = vld [vmem:[%s3124_s5 + $0x10] sm:$0xff]  ;;  %s2424_s27 = smov 96  }
   0xd   :  { %2297 = vrcp.f32 %v2421_v2  ;;  %157 = vmatpush.msra.mxu0 %v129_v14  ;;  %v127_v16 = vld [vmem:[%s3124_s5 + $0x8] sm:$0xff]  ;;  %v126_v17 = vld [vmem:[%s3124_s5] sm:$0xff]  ;;  %vm172_vm5 = vcmask 64512   ;;  %s3149_s0 = sld [smem:[#allocation6_spill]]  ;;  %s2425_s30 = smov 56  }
   0xe   :  { %v2549_v27 = vld [vmem:[%s3122_s3] ss:$0 sm:$0xff]  ;;  %s2422_s3 = smov 88   ;;  %s2426_s18 = smov 80   ;;  %v58_v2 = vld [vmem:[%s3148_s26 + $0x8] sm:$0xff] }
   0xf   :  { %158 = vmatpush.msra.mxu0 %v128_v15  ;;  %v2554_v30 = vld [vmem:[%s3123_s4] ss:$0 sm:$0xff]  ;;  %s3142_s4 = smov 64   ;;  %s2427_s19 = smov 120  }
  0x10   :  { %v2565_v33 = vld [vmem:[%s3125_s6] ss:$0 sm:$0xff]  ;;  %s2428_s1 = smov 112   ;;  %s3138_s20 = smov 48  }
  0x11   :  { %159 = vmatpush.msra.mxu0 %v127_v16  ;;  %s3144_s21 = smov 72   ;;  %s2431_s22 = smov 104   ;;  %v132_v16 = vld [vmem:[%s3126_s7 + $0x8] sm:$0xff] }
  0x12   :  { %s3140_s24 = smov 40   ;;  %s3152_s25 = smov 40  }
  0x13   :  { %v2298_v3 = vpop.eup %2297  ;;  %160 = vmatpush.msra.mxu0 %v126_v17  ;;  %v123_v39 = vld [vmem:[%s3149_s0] sm:$0x3]  ;;  %s2145_s26 = sshll.u32 %s3136_s17, 4  ;;  %s2146_s26 = int_to_ptr.hbm [resolvable:$true] %s2145_s26 }
  0x14   :  { %v69_v4 = vmul.f32 32.0, %v2298_v3  ;;  %vm73_vm1 = vweird.f32 %v2298_v3  ;;  %v124_v40 = vsub.f32 1.0, %v123_v39  ;;  %v131_v17 = vld [vmem:[%s3126_s7] sm:$0xff] }
  0x16   :  { %v70_v5 = vsub.f32 1.0, %v69_v4  ;;  %v2583_v41 = vmul.f32 -1e+09, %v124_v40 }
  0x18   :  { %v71_v6 = vmul.f32 %v2298_v3, %v70_v5  ;;  %v2586_v42 = vperm.slane %v2583_v41, 0 }
  0x1a   :  { %v72_v7 = vadd.f32 %v2298_v3, %v71_v6 }
  0x1c   :  { %v2529_v8 = vsel %vm73_vm1, %v2298_v3, %v72_v7  ;;  %v65_v3 = vsel %vm61_vm0, %v58_v2, 0.0 }
  0x7e   :  { %v64_v9 = vpop.xlane.xlu0 %63 }
  0x7f   :  { %v75_v10 = vmul.f32 %v2529_v8, %v64_v9 }
  0x81   :  { %v77_v11 = vsub.f32 %v57_v0, %v75_v10 }
  0x83   :  { %v79_v12 = vmul.f32 %v77_v11, %v77_v11 }
  0x85   :  { %v81_v13 = vsel %vm61_vm0, %v79_v12, 0.0 }
  0x86   :  { %82 = vadd.xlane.f32.xlu0 %v81_v13 }
  0xf9   :  { %v83_v18 = vpop.xlane.xlu0 %82 }
  0xfa   :  { %v87_v19 = vmul.f32 %v83_v18, %v2529_v8 }
  0xfc   :  { %v89_v20 = vadd.f32 1e-12, %v87_v19 }
  0xfe   :  { %2299 = vrsqrt.f32 %v89_v20  ;;  %vm97_vm3 = vweird.f32 %v89_v20 }
 0x104   :  { %v2300_v21 = vpop.eup %2299 }
 0x105   :  { %v92_v22 = vmul.f32 %v2300_v21, %v89_v20  ;;  %vm98_vm2 = vweird.f32 %v2300_v21 }
 0x106   :  { %vm99_vm4 = vmor %vm97_vm3, %vm98_vm2 }
 0x107   :  { %v93_v23 = vmul.f32 %v2300_v21, %v92_v22 }
 0x109   :  { %v94_v24 = vmul.f32 0.5, %v93_v23 }
 0x10b   :  { %v95_v25 = vsub.f32 1.5, %v94_v24 }
 0x10d   :  { %v96_v26 = vmul.f32 %v2300_v21, %v95_v25 }
 0x10f   :  { %v100_v28 = vsel %vm99_vm4, %v2300_v21, %v96_v26 }
 0x110   :  { %v111_v29 = vmul.f32 %v100_v28, %v77_v11 }
 0x112   :  { %v116_v31 = vmul.f32 %v2549_v27, %v111_v29 }
 0x114   :  { %v2558_v32 = vadd.f32 %v2554_v30, %v116_v31 }
 0x116   :  { %2154 = vmatmul.msk.f32.vlgmr.msra.gmra.mxu0 %vm61_vm0, %v2558_v32 }
 0x193   :  { %v162_v34 = vpop.f32.mrf.mxu0 }
 0x194   :  { %v2568_v35 = vadd.f32 %v2565_v33, %v162_v34 }
 0x196   :  { %236 = vrot.lane.b32.xlu0 %v2568_v35, %s2422_s3  ;;  %208 = vrot.lane.b32.xlu2 %v2568_v35, %s3142_s4 }
 0x197   :  { %170 = vrot.lane.b32.xlu1 %v2568_v35, %s2424_s27 }
 0x1f0   :  { %v209_v36 = vpop.permute.xlu2 %208 }
 0x1f1   :  { %229 = vmatpush.msra.mxu3 %v209_v36 }
 0x208   :  { %v237_v37 = vpop.permute.xlu0 %236 }
 0x209   :  { %v171_v38 = vpop.permute.xlu1 %170  ;;  %2159 = vmatpush.xpose.msk.msrb.mxu3 %vm172_vm5, %v237_v37 }
 0x20a   :  { %2156 = vmatpush.xpose.msk.msra.mxu1 %vm172_vm5, %v171_v38 }
 0x20d   :  { %2157 = vmatmul.msk.f32.vlgmr.msra.gmra.mxu1 %vm172_vm5, %v2568_v35 }
 0x28a   :  { %v194_v43 = vpop.f32.mrf.mxu1 }
 0x28b   :  { %v195_v44 = vadd.f32 %v194_v43, %v2586_v42 }
 0x28d   :  { %v197_v45 = vsel %vm172_vm5, %v195_v44, -inf }
 0x28e   :  { %198 = vmax.xlane.f32.xlu1 %v197_v45 }
 0x2a7   :  { %273 = vrot.lane.b32.xlu1 %v2568_v35, %s2425_s30 }
 0x2af   :  { %347 = vrot.lane.b32.xlu1 %v2568_v35, %s2426_s18 }
 0x301   :  { %v199_v46 = vpop.xlane.xlu1 %198 }
 0x302   :  { %v200_v47 = vsub.f32 %v195_v44, %v199_v46 }
 0x304   :  { %v201_v48 = vmul.f32 1.442695, %v200_v47 }
 0x306   :  { %2301 = vpow2.f32 %v201_v48 }
 0x30c   :  { %v2302_v49 = vpop.eup %2301 }
 0x30d   :  { %v203_v50 = vsel %vm172_vm5, %v2302_v49, 0.0 }
 0x30e   :  { %204 = vadd.xlane.f32.xlu2 %v203_v50 }
 0x319   :  { %v274_v51 = vpop.permute.xlu1 %273 }
 0x31a   :  { %294 = vmatpush.msra.mxu2 %v274_v51 }
 0x321   :  { %v348_v52 = vpop.permute.xlu1 %347 }
 0x322   :  { %2164 = vmatpush.xpose.msk.msrb.mxu2 %vm172_vm5, %v348_v52 }
 0x326   :  { %234 = vrot.lane.b32.xlu2 %v2568_v35, %s2427_s19 }
 0x381   :  { %v205_v53 = vpop.xlane.xlu2 %204 }
 0x382   :  { %2303 = vrcp.f32 %v205_v53 }
 0x388   :  { %v2304_v54 = vpop.eup %2303 }
 0x389   :  { %v207_v55 = vmul.f32 %v2304_v54, %v2302_v49  ;;  %v235_v56 = vpop.permute.xlu2 %234 }
 0x38b   :  { %2158 = vmatmul.msk.f32.vlgmr.msra.gmra.mxu3 %vm172_vm5, %v207_v55 }
 0x38c   :  { %317 = vmatpush.msra.mxu3 %v132_v16 }
 0x393   :  { %2160 = vmatmul.msk.f32.vlgmr.msrb.gmra.mxu3 %vm172_vm5, %v235_v56 }
 0x394   :  { %340 = vmatpush.msrb.mxu3 %v131_v17 }
 0x40e   :  { %v231_v57 = vpop.f32.mrf.mxu3 }
 0x416   :  { %v259_v58 = vpop.f32.mrf.mxu3 }
 0x417   :  { %v260_v59 = vadd.f32 %v259_v58, %v2586_v42 }
 0x419   :  { %v262_v60 = vsel %vm172_vm5, %v260_v59, -inf }
 0x41a   :  { %263 = vmax.xlane.f32.xlu0 %v262_v60 }
 0x42e   :  { %345 = vrot.lane.b32.xlu0 %v2568_v35, %s2428_s1 }
 0x436   :  { %384 = vrot.lane.b32.xlu0 %v2568_v35, %s3138_s20 }
 0x43e   :  { %436 = vrot.lane.b32.xlu0 %v2568_v35, %s3144_s21 }
 0x446   :  { %434 = vrot.lane.b32.xlu0 %v2568_v35, %s2431_s22 }
 0x48d   :  { %v264_v61 = vpop.xlane.xlu0 %263 }
 0x48e   :  { %v265_v62 = vsub.f32 %v260_v59, %v264_v61  ;;  %v2657_v59 = vperm.slane %v2583_v41, 1 }
 0x490   :  { %v266_v63 = vmul.f32 1.442695, %v265_v62 }
 0x492   :  { %2305 = vpow2.f32 %v266_v63 }
 0x498   :  { %v2306_v0 = vpop.eup %2305 }
 0x499   :  { %v268_v1 = vsel %vm172_vm5, %v2306_v0, 0.0 }
 0x49a   :  { %269 = vadd.xlane.f32.xlu2 %v268_v1 }
 0x4a0   :  { %v346_v4 = vpop.permute.xlu0 %345 }
 0x4a2   :  { %66 = vadd.xlane.f32.xlu2 %v65_v3 }
 0x4a8   :  { %v385_v5 = vpop.permute.xlu0 %384 }
 0x4a9   :  { %405 = vmatpush.msrb.mxu1 %v385_v5 }
 0x4b0   :  { %v437_v6 = vpop.permute.xlu0 %436 }
 0x4b1   :  { %2168 = vmatpush.xpose.msk.msrb.mxu0 %vm172_vm5, %v437_v6 }
 0x4b8   :  { %v435_v40 = vpop.permute.xlu0 %434 }
 0x50d   :  { %v270_v7 = vpop.xlane.xlu2 %269 }
 0x50e   :  { %2307 = vrcp.f32 %v270_v7 }
 0x514   :  { %v2308_v9 = vpop.eup %2307 }
 0x515   :  { %v67_v10 = vpop.xlane.xlu2 %66  ;;  %v272_v11 = vmul.f32 %v2308_v9, %v2306_v0 }
 0x516   :  { %v76_v12 = vmul.f32 %v2529_v8, %v67_v10 }
 0x517   :  { %2161 = vmatmul.msk.f32.vlgmr.msra.gmra.mxu2 %vm172_vm5, %v272_v11 }
 0x518   :  { %v78_v13 = vsub.f32 %v58_v2, %v76_v12 }
 0x51a   :  { %v80_v14 = vmul.f32 %v78_v13, %v78_v13 }
 0x51c   :  { %v84_v15 = vsel %vm61_vm0, %v80_v14, 0.0 }
 0x51d   :  { %85 = vadd.xlane.f32.xlu1 %v84_v15 }
 0x51f   :  { %2165 = vmatmul.msk.f32.vlgmr.msrb.gmra.mxu2 %vm172_vm5, %v346_v4 }
 0x590   :  { %v86_v18 = vpop.xlane.xlu1 %85 }
 0x591   :  { %v88_v19 = vmul.f32 %v86_v18, %v2529_v8 }
 0x593   :  { %v90_v20 = vadd.f32 1e-12, %v88_v19 }
 0x595   :  { %2309 = vrsqrt.f32 %v90_v20  ;;  %vm107_vm6 = vweird.f32 %v90_v20 }
 0x59a   :  { %v296_v21 = vpop.f32.mrf.mxu2 }
 0x59b   :  { %v2310_v22 = vpop.eup %2309  ;;  %2162 = vmatmul.msk.f32.vlgmr.msra.gmra.mxu3 %vm172_vm5, %v296_v21 }
 0x59c   :  { %v102_v23 = vmul.f32 %v2310_v22, %v90_v20  ;;  %vm108_vm7 = vweird.f32 %v2310_v22 }
 0x59d   :  { %vm109_vm8 = vmor %vm107_vm6, %vm108_vm7 }
 0x59e   :  { %v103_v24 = vmul.f32 %v2310_v22, %v102_v23 }
 0x5a0   :  { %v104_v25 = vmul.f32 0.5, %v103_v24 }
 0x5a2   :  { %v105_v26 = vsub.f32 1.5, %v104_v25  ;;  %v370_v28 = vpop.f32.mrf.mxu2  ;;  %v134_v25 = vld [vmem:[%s3126_s7 + $0x18] sm:$0xff] }
 0x5a3   :  { %v371_v29 = vadd.f32 %v370_v28, %v2586_v42  ;;  %2163 = vmatmul.msk.f32.vlgmr.msrb.gmra.mxu3 %vm172_vm5, %v231_v57  ;;  %517 = vmatpush.msra.mxu1 %v134_v25 }
 0x5a4   :  { %v106_v31 = vmul.f32 %v2310_v22, %v105_v26 }
 0x5a5   :  { %v373_v34 = vsel %vm172_vm5, %v371_v29, -inf }
 0x5a6   :  { %v110_v36 = vsel %vm109_vm8, %v2310_v22, %v106_v31  ;;  %374 = vmax.xlane.f32.xlu2 %v373_v34 }
 0x5a7   :  { %v112_v37 = vmul.f32 %v110_v36, %v78_v13 }
 0x5a9   :  { %v117_v38 = vmul.f32 %v2549_v27, %v112_v37 }
 0x5ab   :  { %v2633_v39 = vadd.f32 %v2554_v30, %v117_v38  ;;  %v133_v30 = vld [vmem:[%s3126_s7 + $0x10] sm:$0xff] }
 0x5ac   :  { %428 = vmatpush.msra.mxu3 %v133_v30 }
 0x5ad   :  { %2155 = vmatmul.msk.f32.gmra.mxu0 %vm61_vm0, %v2633_v39 }
 0x5b5   :  { %2169 = vmatmul.msk.f32.vlgmr.msrb.gmra.mxu0 %vm172_vm5, %v435_v40 }
 0x619   :  { %v375_v43 = vpop.xlane.xlu2 %374 }
 0x61a   :  { %v376_v44 = vsub.f32 %v371_v29, %v375_v43 }
 0x61c   :  { %v377_v45 = vmul.f32 1.442695, %v376_v44 }
 0x61e   :  { %2311 = vpow2.f32 %v377_v45  ;;  %v319_v54 = vpop.f32.mrf.mxu3 }
 0x624   :  { %v2312_v46 = vpop.eup %2311 }
 0x625   :  { %v379_v47 = vsel %vm172_vm5, %v2312_v46, 0.0 }
 0x626   :  { %380 = vadd.xlane.f32.xlu2 %v379_v47  ;;  %v342_v55 = vpop.f32.mrf.mxu3 }
 0x627   :  { %v343_v56 = vadd.f32 %v342_v55, %v319_v54 }
 0x62a   :  { %v165_v48 = vpop.f32.mrf.mxu0 }
 0x62b   :  { %v2640_v27 = vadd.f32 %v2565_v33, %v165_v48 }
 0x632   :  { %v459_v3 = vpop.f32.mrf.mxu0 }
 0x633   :  { %v460_v4 = vadd.f32 %v459_v3, %v2586_v42 }
 0x635   :  { %v462_v5 = vsel %vm172_vm5, %v460_v4, -inf }
 0x63e   :  { %525 = vrot.lane.b32.xlu2 %v2640_v27, %s2424_s27 }
 0x646   :  { %562 = vrot.lane.b32.xlu2 %v2640_v27, %s3142_s4 }
 0x699   :  { %v381_v49 = vpop.xlane.xlu2 %380 }
 0x69a   :  { %2313 = vrcp.f32 %v381_v49 }
 0x6a0   :  { %v2314_v50 = vpop.eup %2313 }
 0x6a1   :  { %v526_v51 = vpop.permute.xlu2 %525  ;;  %v383_v52 = vmul.f32 %v2314_v50, %v2312_v46 }
 0x6a2   :  { %2172 = vmatpush.xpose.msk.msrb.mxu3 %vm172_vm5, %v526_v51 }
 0x6a3   :  { %2166 = vmatmul.msk.f32.vlgmr.msrb.gmra.mxu1 %vm172_vm5, %v383_v52 }
 0x6a9   :  { %v563_v33 = vpop.permute.xlu2 %562 }
 0x6aa   :  { %583 = vmatpush.msra.mxu0 %v563_v33 }
 0x6ac   :  { %694 = vmatpush.msrb.mxu0 %v131_v17 }
 0x720   :  { %v407_v53 = vpop.f32.mrf.mxu1 }
 0x721   :  { %2167 = vmatmul.msk.f32.vlgmr.msra.gmra.mxu3 %vm172_vm5, %v407_v53 }
 0x722   :  { %671 = vmatpush.msra.mxu3 %v132_v16 }
 0x729   :  { %2173 = vmatmul.msk.f32.vlgmr.msrb.gmra.mxu3 %vm172_vm5, %v2640_v27 }
 0x72a   :  { %782 = vmatpush.msrb.mxu3 %v133_v30 }
 0x7a4   :  { %v430_v57 = vpop.f32.mrf.mxu3 }
 0x7a5   :  { %v2654_v58 = vadd.f32 %v430_v57, %v343_v56 }
 0x7ac   :  { %v548_v60 = vpop.f32.mrf.mxu3 }
 0x7ad   :  { %v549_v61 = vadd.f32 %v548_v60, %v2657_v59 }
 0x7af   :  { %v551_v62 = vsel %vm172_vm5, %v549_v61, -inf }
 0x7b0   :  { %552 = vmax.xlane.f32.xlu0 %v551_v62  ;;  %v2713_v62 = vld [vmem:[%s3127_s8] ss:$0 sm:$0xff] }
 0x7c4   :  { %590 = vrot.lane.b32.xlu0 %v2640_v27, %s2422_s3 }
 0x7cc   :  { %788 = vrot.lane.b32.xlu0 %v2640_v27, %s2431_s22 }
 0x823   :  { %v553_v63 = vpop.xlane.xlu0 %552 }
 0x824   :  { %v554_v0 = vsub.f32 %v549_v61, %v553_v63 }
 0x826   :  { %v555_v1 = vmul.f32 1.442695, %v554_v0 }
 0x828   :  { %2315 = vpow2.f32 %v555_v1 }
 0x82e   :  { %v2316_v2 = vpop.eup %2315 }
 0x82f   :  { %v557_v41 = vsel %vm172_vm5, %v2316_v2, 0.0 }
 0x830   :  { %558 = vadd.xlane.f32.xlu1 %v557_v41 }
 0x836   :  { %v591_v15 = vpop.permute.xlu0 %590 }
 0x838   :  { %463 = vmax.xlane.f32.xlu1 %v462_v5 }
 0x83e   :  { %v789_v22 = vpop.permute.xlu0 %788 }
 0x851   :  { %473 = vrot.lane.b32.xlu1 %v2568_v35, %s3140_s24 }
 0x859   :  { %588 = vrot.lane.b32.xlu1 %v2640_v27, %s2427_s19 }
 0x861   :  { %701 = vrot.lane.b32.xlu1 %v2640_v27, %s2426_s18 }
 0x869   :  { %790 = vrot.lane.b32.xlu1 %v2640_v27, %s3144_s21 }
 0x8a3   :  { %v559_v6 = vpop.xlane.xlu1 %558 }
 0x8a4   :  { %2317 = vrcp.f32 %v559_v6 }
 0x8aa   :  { %v2318_v7 = vpop.eup %2317 }
 0x8ab   :  { %v561_v9 = vmul.f32 %v2318_v7, %v2316_v2  ;;  %v464_v10 = vpop.xlane.xlu1 %463 }
 0x8ac   :  { %v465_v11 = vsub.f32 %v460_v4, %v464_v10 }
 0x8ad   :  { %2174 = vmatmul.msk.f32.vlgmr.msra.gmra.mxu0 %vm172_vm5, %v561_v9 }
 0x8ae   :  { %v466_v12 = vmul.f32 1.442695, %v465_v11 }
 0x8b0   :  { %2319 = vpow2.f32 %v466_v12 }
 0x8b6   :  { %v2320_v35 = vpop.eup %2319 }
 0x8b7   :  { %v468_v13 = vsel %vm172_vm5, %v2320_v35, 0.0 }
 0x8b8   :  { %469 = vadd.xlane.f32.xlu2 %v468_v13 }
 0x8c3   :  { %v474_v14 = vpop.permute.xlu1 %473 }
 0x8c4   :  { %494 = vmatpush.msra.mxu2 %v474_v14 }
 0x8c6   :  { %2175 = vmatpush.xpose.msk.msrb.mxu2 %vm172_vm5, %v591_v15 }
 0x8cb   :  { %v589_v16 = vpop.permute.xlu1 %588 }
 0x8d0   :  { %699 = vrot.lane.b32.xlu2 %v2640_v27, %s2428_s1 }
 0x8d3   :  { %v702_v17 = vpop.permute.xlu1 %701 }
 0x8db   :  { %v791_v18 = vpop.permute.xlu1 %790 }
 0x8dc   :  { %2184 = vmatpush.xpose.msk.msra.mxu0 %vm172_vm5, %v791_v18  ;;  %v943_v18 = vld [vmem:[%s3130_s11 + $0x18] sm:$0xff] }
 0x92a   :  { %v585_v19 = vpop.f32.mrf.mxu0 }
 0x92b   :  { %2179 = vmatmul.msk.f32.vlgmr.msrb.gmra.mxu0 %vm172_vm5, %v585_v19  ;;  %v470_v20 = vpop.xlane.xlu2 %469  ;;  %v942_v19 = vld [vmem:[%s3130_s11 + $0x10] sm:$0xff] }
 0x92c   :  { %2321 = vrcp.f32 %v470_v20  ;;  %v941_v20 = vld [vmem:[%s3130_s11 + $0x8] sm:$0xff] }
 0x932   :  { %v2322_v21 = vpop.eup %2321 }
 0x933   :  { %v472_v23 = vmul.f32 %v2322_v21, %v2320_v35  ;;  %2185 = vmatmul.msk.f32.vlgmr.msra.gmra.mxu0 %vm172_vm5, %v789_v22  ;;  %v700_v24 = vpop.permute.xlu2 %699  ;;  %v940_v21 = vld [vmem:[%s3130_s11] sm:$0xff] }
 0x935   :  { %2170 = vmatmul.msk.f32.vlgmr.msra.gmra.mxu2 %vm172_vm5, %v472_v23 }
 0x936   :  { %2180 = vmatpush.xpose.msk.msra.mxu2 %vm172_vm5, %v702_v17 }
 0x93d   :  { %2176 = vmatmul.msk.f32.vlgmr.msrb.gmra.mxu2 %vm172_vm5, %v589_v16 }
 0x945   :  { %2181 = vmatmul.msk.f32.vlgmr.msra.gmra.mxu2 %vm172_vm5, %v700_v24 }
 0x9a8   :  { %v2691_v26 = vpop.f32.mrf.mxu0 }
 0x9b0   :  { %v813_v28 = vpop.f32.mrf.mxu0 }
 0x9b1   :  { %v814_v29 = vadd.f32 %v813_v28, %v2657_v59 }
 0x9b3   :  { %v816_v31 = vsel %vm172_vm5, %v814_v29, -inf }
 0x9b4   :  { %817 = vmax.xlane.f32.xlu2 %v816_v31 }
 0x9b8   :  { %v496_v34 = vpop.f32.mrf.mxu2 }
 0x9b9   :  { %2171 = vmatmul.msk.f32.vlgmr.msra.gmra.mxu1 %vm172_vm5, %v496_v34 }
 0x9c0   :  { %v613_v36 = vpop.f32.mrf.mxu2 }
 0x9c1   :  { %v614_v37 = vadd.f32 %v613_v36, %v2657_v59 }
 0x9c3   :  { %v616_v38 = vsel %vm172_vm5, %v614_v37, -inf }
 0x9c4   :  { %617 = vmax.xlane.f32.xlu1 %v616_v38 }
 0x9c8   :  { %v724_v40 = vpop.f32.mrf.mxu2 }
 0x9c9   :  { %v725_v43 = vadd.f32 %v724_v40, %v2657_v59 }
 0x9cb   :  { %v727_v44 = vsel %vm172_vm5, %v725_v43, -inf }
 0x9cc   :  { %738 = vrot.lane.b32.xlu2 %v2640_v27, %s3138_s20  ;;  %728 = vmax.xlane.f32.xlu0 %v727_v44 }
 0xa27   :  { %v818_v48 = vpop.xlane.xlu2 %817 }
 0xa28   :  { %v819_v51 = vsub.f32 %v814_v29, %v818_v48  ;;  %v1008_v48 = vld [vmem:[%s3132_s13 + $0x68] sm:$0xff] }
 0xa2a   :  { %v820_v53 = vmul.f32 1.442695, %v819_v51 }
 0xa2f   :  { %v739_v5 = vpop.permute.xlu2 %738 }
 0xa36   :  { %v519_v60 = vpop.f32.mrf.mxu1 }
 0xa37   :  { %v618_v45 = vpop.xlane.xlu1 %617  ;;  %v522_v61 = vadd.f32 %v519_v60, %v2654_v58  ;;  %v1004_v60 = vld [vmem:[%s3132_s13 + $0x48] sm:$0xff] }
 0xa38   :  { %v619_v46 = vsub.f32 %v614_v37, %v618_v45  ;;  %v2742_v37 = vld [vmem:[%s3128_s9] ss:$0 sm:$0xff] }
 0xa39   :  { %v880_v63 = vadd.f32 %v2713_v62, %v522_v61  ;;  %v1002_v61 = vld [vmem:[%s3132_s13 + $0x38] sm:$0xff] }
 0xa3a   :  { %v620_v47 = vmul.f32 1.442695, %v619_v46  ;;  %v1010_v46 = vld [vmem:[%s3132_s13 + $0x78] sm:$0xff] }
 0xa3b   :  { %v882_v0 = vadd.f32 %v880_v63, %v2558_v32  ;;  %1015 = vmatpush.msrb.mxu0 %v1010_v46  ;;  %v1000_v63 = vld [vmem:[%s3132_s13 + $0x28] sm:$0xff] }
 0xa3c   :  { %2323 = vpow2.f32 %v620_v47  ;;  %v1009_v47 = vld [vmem:[%s3132_s13 + $0x70] sm:$0xff] }
 0xa3d   :  { %v886_v1 = vsel %vm61_vm0, %v882_v0, 0.0  ;;  %1016 = vmatpush.msrb.mxu0 %v1009_v47 }
 0xa3f   :  { %v729_v30 = vpop.xlane.xlu0 %728  ;;  %1017 = vmatpush.msrb.mxu0 %v1008_v48 }
 0xa40   :  { %v730_v49 = vsub.f32 %v725_v43, %v729_v30  ;;  %v2747_v43 = vld [vmem:[%s3129_s10] ss:$0 sm:$0xff] }
 0xa41   :  { %v1007_v30 = vld [vmem:[%s3132_s13 + $0x60] sm:$0xff] }
 0xa42   :  { %v2324_v50 = vpop.eup %2323  ;;  %v731_v52 = vmul.f32 1.442695, %v730_v49  ;;  %1018 = vmatpush.msrb.mxu0 %v1007_v30 }
 0xa43   :  { %v622_v33 = vsel %vm172_vm5, %v2324_v50, 0.0 }
 0xa44   :  { %2325 = vpow2.f32 %v731_v52  ;;  %623 = vadd.xlane.f32.xlu1 %v622_v33 }
 0xa45   :  { %2327 = vpow2.f32 %v820_v53 }
 0xa4a   :  { %v2326_v54 = vpop.eup %2325 }
 0xa4b   :  { %v733_v55 = vsel %vm172_vm5, %v2326_v54, 0.0  ;;  %v2328_v56 = vpop.eup %2327 }
 0xa4c   :  { %734 = vadd.xlane.f32.xlu0 %v733_v55  ;;  %v822_v57 = vsel %vm172_vm5, %v2328_v56, 0.0 }
 0xa54   :  { %823 = vadd.xlane.f32.xlu0 %v822_v57  ;;  %v1006_v57 = vld [vmem:[%s3132_s13 + $0x58] sm:$0xff] }
 0xa55   :  { %1019 = vmatpush.msrb.mxu0 %v1006_v57 }
 0xa5d   :  { %627 = vrot.lane.b32.xlu1 %v2640_v27, %s2425_s30 }
 0xa68   :  { %827 = vrot.lane.b32.xlu0 %v2640_v27, %s3140_s24 }
 0xa87   :  { %887 = vadd.xlane.f32.xlu1 %v886_v1  ;;  %v998_v1 = vld [vmem:[%s3132_s13 + $0x18] sm:$0xff] }
 0xab7   :  { %v624_v2 = vpop.xlane.xlu1 %623 }
 0xab8   :  { %2329 = vrcp.f32 %v624_v2  ;;  %v997_v2 = vld [vmem:[%s3132_s13 + $0x10] sm:$0xff] }
 0xabe   :  { %v2330_v3 = vpop.eup %2329 }
 0xabf   :  { %v735_v41 = vpop.xlane.xlu0 %734  ;;  %v626_v4 = vmul.f32 %v2330_v3, %v2324_v50  ;;  %v995_v3 = vld [vmem:[%s3132_s13] sm:$0xff] }
 0xac0   :  { %2331 = vrcp.f32 %v735_v41  ;;  %v996_v41 = vld [vmem:[%s3132_s13 + $0x8] sm:$0xff] }
 0xac6   :  { %v2332_v6 = vpop.eup %2331 }
 0xac7   :  { %v824_v27 = vpop.xlane.xlu0 %823  ;;  %v737_v7 = vmul.f32 %v2332_v6, %v2326_v54 }
 0xac8   :  { %2333 = vrcp.f32 %v824_v27  ;;  %v2285_v27 = vld [vmem:[%s3131_s12] ss:$0 sm:$0xff] }
 0xace   :  { %v2334_v32 = vpop.eup %2333 }
 0xacf   :  { %v628_v58 = vpop.permute.xlu1 %627  ;;  %v826_v9 = vmul.f32 %v2334_v32, %v2328_v56 }
 0xad0   :  { %648 = vmatpush.msrb.mxu1 %v628_v58 }
 0xad1   :  { %2177 = vmatmul.msk.f32.vlgmr.msrb.gmra.mxu1 %vm172_vm5, %v626_v4 }
 0xad2   :  { %759 = vmatpush.msra.mxu1 %v739_v5 }
 0xad4   :  { %871 = vmatpush.msrb.mxu1 %v134_v25 }
 0xad9   :  { %2182 = vmatmul.msk.f32.vlgmr.msra.gmra.mxu1 %vm172_vm5, %v737_v7 }
 0xada   :  { %v828_v10 = vpop.permute.xlu0 %827 }
 0xadb   :  { %848 = vmatpush.msrb.mxu2 %v828_v10 }
 0xadc   :  { %2186 = vmatmul.msk.f32.vlgmr.msrb.gmra.mxu2 %vm172_vm5, %v826_v9 }
 0xafa   :  { %v888_v11 = vpop.xlane.xlu1 %887 }
 0xafb   :  { %v892_v12 = vmul.f32 %v888_v11, %v2529_v8 }
 0xafd   :  { %v894_v35 = vsub.f32 %v882_v0, %v892_v12  ;;  %v999_v0 = vld [vmem:[%s3132_s13 + $0x20] sm:$0xff] }
 0xaff   :  { %v896_v13 = vmul.f32 %v894_v35, %v894_v35 }
 0xb01   :  { %v898_v14 = vsel %vm61_vm0, %v896_v13, 0.0 }
 0xb02   :  { %899 = vadd.xlane.f32.xlu2 %v898_v14 }
 0xb4e   :  { %v650_v15 = vpop.f32.mrf.mxu1 }
 0xb4f   :  { %2178 = vmatmul.msk.f32.vlgmr.msra.gmra.mxu3 %vm172_vm5, %v650_v15 }
 0xb50   :  { %966 = vmatpush.msra.mxu3 %v943_v18  ;;  %v2815_v18 = vld [vmem:[%s3133_s14] ss:$0 sm:$0xff] }
 0xb52   :  { %967 = vmatpush.msra.mxu3 %v942_v19 }
 0xb54   :  { %968 = vmatpush.msra.mxu3 %v941_v20 }
 0xb56   :  { %v761_v16 = vpop.f32.mrf.mxu1  ;;  %969 = vmatpush.msra.mxu3 %v940_v21 }
 0xb57   :  { %2183 = vmatmul.msk.f32.vlgmr.msrb.gmra.mxu3 %vm172_vm5, %v761_v16 }
 0xb5f   :  { %v850_v17 = vpop.f32.mrf.mxu2 }
 0xb60   :  { %2187 = vmatmul.msk.f32.vlgmr.msrb.gmra.mxu1 %vm172_vm5, %v850_v17 }
 0xb75   :  { %v900_v22 = vpop.xlane.xlu2 %899 }
 0xb76   :  { %v904_v23 = vmul.f32 %v900_v22, %v2529_v8 }
 0xb78   :  { %v906_v24 = vadd.f32 1e-12, %v904_v23 }
 0xb7a   :  { %2335 = vrsqrt.f32 %v906_v24  ;;  %vm914_vm10 = vweird.f32 %v906_v24 }
 0xb80   :  { %v2336_v25 = vpop.eup %2335 }
 0xb81   :  { %v909_v28 = vmul.f32 %v2336_v25, %v906_v24  ;;  %vm915_vm9 = vweird.f32 %v2336_v25 }
 0xb82   :  { %vm916_vm11 = vmor %vm914_vm10, %vm915_vm9 }
 0xb83   :  { %v910_v29 = vmul.f32 %v2336_v25, %v909_v28 }
 0xb85   :  { %v911_v31 = vmul.f32 0.5, %v910_v29 }
 0xb87   :  { %v912_v34 = vsub.f32 1.5, %v911_v31 }
 0xb89   :  { %v913_v36 = vmul.f32 %v2336_v25, %v912_v34 }
 0xb8b   :  { %v917_v38 = vsel %vm916_vm11, %v2336_v25, %v913_v36 }
 0xb8c   :  { %v928_v40 = vmul.f32 %v917_v38, %v894_v35 }
 0xb8e   :  { %v933_v44 = vmul.f32 %v2742_v37, %v928_v40 }
 0xb90   :  { %v2751_v45 = vadd.f32 %v2747_v43, %v933_v44 }
 0xb92   :  { %2188 = vmatmul.msk.f32.vlgmr.msra.gmra.mxu3 %vm61_vm0, %v2751_v45 }
 0xbd2   :  { %v673_v49 = vpop.f32.mrf.mxu3 }
 0xbd3   :  { %v697_v50 = vadd.f32 %v2691_v26, %v673_v49  ;;  %v1005_v26 = vld [vmem:[%s3132_s13 + $0x50] sm:$0xff] }
 0xbd4   :  { %1020 = vmatpush.msrb.mxu0 %v1005_v26 }
 0xbd6   :  { %1021 = vmatpush.msrb.mxu0 %v1004_v60  ;;  %v2193_v60 = vld [vmem:[%s3124_s5 + $0x38] sm:$0xff] }
 0xbd7   :  { %1131 = vmatpush.msra.mxu1 %v2193_v60 }
 0xbda   :  { %v784_v51 = vpop.f32.mrf.mxu3 }
 0xbdb   :  { %v787_v52 = vadd.f32 %v784_v51, %v697_v50 }
 0xbdd   :  { %v873_v33 = vpop.f32.mrf.mxu1 }
 0xbde   :  { %v876_v53 = vadd.f32 %v873_v33, %v787_v52 }
 0xbe0   :  { %v881_v54 = vadd.f32 %v2713_v62, %v876_v53  ;;  %v1001_v62 = vld [vmem:[%s3132_s13 + $0x30] sm:$0xff] }
 0xbe2   :  { %v883_v55 = vadd.f32 %v881_v54, %v2633_v39  ;;  %v1003_v39 = vld [vmem:[%s3132_s13 + $0x40] sm:$0xff] }
 0xbe3   :  { %1022 = vmatpush.msrb.mxu0 %v1003_v39  ;;  %v2192_v39 = vld [vmem:[%s3124_s5 + $0x30] sm:$0xff] }
 0xbe4   :  { %v889_v56 = vsel %vm61_vm0, %v883_v55, 0.0  ;;  %1132 = vmatpush.msra.mxu1 %v2192_v39 }
 0xbe5   :  { %890 = vadd.xlane.f32.xlu0 %v889_v56  ;;  %1023 = vmatpush.msrb.mxu0 %v1002_v61  ;;  %v2191_v61 = vld [vmem:[%s3124_s5 + $0x28] sm:$0xff] }
 0xbe6   :  { %1133 = vmatpush.msra.mxu1 %v2191_v61 }
 0xbe7   :  { %1024 = vmatpush.msrb.mxu0 %v1001_v62  ;;  %v2190_v62 = vld [vmem:[%s3124_s5 + $0x20] sm:$0xff] }
 0xbe8   :  { %1134 = vmatpush.msra.mxu1 %v2190_v62 }
 0xbe9   :  { %1025 = vmatpush.msrb.mxu0 %v1000_v63 }
 0xbeb   :  { %1026 = vmatpush.msrb.mxu0 %v999_v0 }
 0xbed   :  { %1027 = vmatpush.msrb.mxu0 %v998_v1 }
 0xbef   :  { %1028 = vmatpush.msrb.mxu0 %v997_v2 }
 0xbf1   :  { %1029 = vmatpush.msrb.mxu0 %v996_v41 }
 0xbf3   :  { %1030 = vmatpush.msrb.mxu0 %v995_v3 }
 0xc15   :  { %v971_v4 = vpop.f32.mrf.mxu3 }
 0xc16   :  { %v972_v58 = vadd.f32 %v2285_v27, %v971_v4 }
 0xc18   :  { %v979_v5 = vmul.f32 0.044715, %v972_v58  ;;  %v977_v11 = vmul.f32 0.5, %v972_v58 }
 0xc1a   :  { %v981_v6 = vmul.f32 %v979_v5, %v972_v58  ;;  %v2287_v5 = vld [vmem:[%s3134_s15] ss:$0 sm:$0xff] }
 0xc1c   :  { %v983_v32 = vmul.f32 %v981_v6, %v972_v58 }
 0xc1e   :  { %v985_v7 = vadd.f32 %v983_v32, %v972_v58 }
 0xc20   :  { %v987_v9 = vmul.f32 0.7978846, %v985_v7  ;;  %v2288_v7 = vld [vmem:[%s3135_s16] ss:$0 sm:$0xff] }
 0xc22   :  { %2337 = vtanh.f32 %v987_v9 }
 0xc28   :  { %v2338_v10 = vpop.eup %2337 }
 0xc29   :  { %v991_v12 = vadd.f32 1.0, %v2338_v10 }
 0xc2b   :  { %v993_v35 = vmul.f32 %v991_v12, %v977_v11 }
 0xc2d   :  { %1031 = vmatmul.f32.vlgmr.msrb.gmra.mxu0 %v993_v35 }
 0xc58   :  { %v891_v13 = vpop.xlane.xlu0 %890 }
 0xc59   :  { %v893_v14 = vmul.f32 %v891_v13, %v2529_v8 }
 0xc5b   :  { %v895_v15 = vsub.f32 %v883_v55, %v893_v14  ;;  %v2289_v14 = vld [vmem:[%s3125_s6 + $0x1] ss:$0 sm:$0xff]  ;;  %s3150_s6 = smov 72  }
 0xc5d   :  { %v897_v16 = vmul.f32 %v895_v15, %v895_v15 }
 0xc5f   :  { %v901_v17 = vsel %vm61_vm0, %v897_v16, 0.0 }
 0xc60   :  { %902 = vadd.xlane.f32.xlu1 %v901_v17 }
 0xcaa   :  { %v1032_v19 = vpop.f32.mrf.mxu0 }
 0xcab   :  { %v1033_v20 = vadd.f32 %v2815_v18, %v1032_v19 }
 0xcad   :  { %v1038_v21 = vadd.f32 %v1033_v20, %v2751_v45 }
 0xcaf   :  { %v1042_v22 = vsel %vm61_vm0, %v1038_v21, 0.0 }
 0xcb0   :  { %1043 = vadd.xlane.f32.xlu2 %v1042_v22 }
 0xcd3   :  { %v903_v23 = vpop.xlane.xlu1 %902 }
 0xcd4   :  { %v905_v24 = vmul.f32 %v903_v23, %v2529_v8 }
 0xcd6   :  { %v907_v25 = vadd.f32 1e-12, %v905_v24 }
 0xcd8   :  { %2339 = vrsqrt.f32 %v907_v25  ;;  %vm924_vm13 = vweird.f32 %v907_v25 }
 0xcde   :  { %v2340_v28 = vpop.eup %2339 }
 0xcdf   :  { %v919_v29 = vmul.f32 %v2340_v28, %v907_v25  ;;  %vm925_vm12 = vweird.f32 %v2340_v28 }
 0xce0   :  { %vm926_vm14 = vmor %vm924_vm13, %vm925_vm12  ;;  %vm2096_vm12 = vcmask 7168  }
 0xce1   :  { %v920_v31 = vmul.f32 %v2340_v28, %v919_v29 }
 0xce3   :  { %v921_v34 = vmul.f32 0.5, %v920_v31 }
 0xce5   :  { %v922_v36 = vsub.f32 1.5, %v921_v34 }
 0xce7   :  { %v923_v38 = vmul.f32 %v2340_v28, %v922_v36 }
 0xce9   :  { %v927_v40 = vsel %vm926_vm14, %v2340_v28, %v923_v38 }
 0xcea   :  { %v929_v44 = vmul.f32 %v927_v40, %v895_v15 }
 0xcec   :  { %v934_v45 = vmul.f32 %v2742_v37, %v929_v44 }
 0xcee   :  { %v939_v46 = vadd.f32 %v2747_v43, %v934_v45 }
 0xcf0   :  { %2189 = vmatmul.msk.f32.gmra.mxu3 %vm61_vm0, %v939_v46 }
 0xd23   :  { %v1044_v47 = vpop.xlane.xlu2 %1043 }
 0xd24   :  { %v1048_v48 = vmul.f32 %v1044_v47, %v2529_v8 }
 0xd26   :  { %v1050_v30 = vsub.f32 %v1038_v21, %v1048_v48 }
 0xd28   :  { %v1052_v49 = vmul.f32 %v1050_v30, %v1050_v30 }
 0xd2a   :  { %v1054_v50 = vsel %vm61_vm0, %v1052_v49, 0.0 }
 0xd2b   :  { %1055 = vadd.xlane.f32.xlu0 %v1054_v50 }
 0xd73   :  { %v974_v51 = vpop.f32.mrf.mxu3 }
 0xd74   :  { %v975_v52 = vadd.f32 %v2285_v27, %v974_v51 }
 0xd76   :  { %v980_v33 = vmul.f32 0.044715, %v975_v52  ;;  %v978_v43 = vmul.f32 0.5, %v975_v52 }
 0xd78   :  { %v982_v53 = vmul.f32 %v980_v33, %v975_v52 }
 0xd7a   :  { %v984_v54 = vmul.f32 %v982_v53, %v975_v52 }
 0xd7c   :  { %v986_v55 = vadd.f32 %v984_v54, %v975_v52 }
 0xd7e   :  { %v988_v56 = vmul.f32 0.7978846, %v986_v55 }
 0xd80   :  { %2341 = vtanh.f32 %v988_v56 }
 0xd86   :  { %v2342_v37 = vpop.eup %2341 }
 0xd87   :  { %v992_v57 = vadd.f32 1.0, %v2342_v37 }
 0xd89   :  { %v994_v26 = vmul.f32 %v992_v57, %v978_v43 }
 0xd8b   :  { %1034 = vmatmul.f32.gmra.mxu0 %v994_v26 }
 0xd9e   :  { %v1056_v63 = vpop.xlane.xlu0 %1055 }
 0xd9f   :  { %v1060_v0 = vmul.f32 %v1056_v63, %v2529_v8 }
 0xda1   :  { %v1062_v1 = vadd.f32 1e-12, %v1060_v0 }
 0xda3   :  { %2343 = vrsqrt.f32 %v1062_v1  ;;  %vm1070_vm1 = vweird.f32 %v1062_v1 }
 0xda9   :  { %v2344_v2 = vpop.eup %2343 }
 0xdaa   :  { %v1065_v41 = vmul.f32 %v2344_v2, %v1062_v1  ;;  %vm1071_vm15 = vweird.f32 %v2344_v2 }
 0xdab   :  { %vm1072_vm2 = vmor %vm1070_vm1, %vm1071_vm15 }
 0xdac   :  { %v1066_v3 = vmul.f32 %v2344_v2, %v1065_v41 }
 0xdae   :  { %v1067_v27 = vmul.f32 0.5, %v1066_v3 }
 0xdb0   :  { %v1068_v4 = vsub.f32 1.5, %v1067_v27 }
 0xdb2   :  { %v1069_v58 = vmul.f32 %v2344_v2, %v1068_v4 }
 0xdb4   :  { %v1073_v6 = vsel %vm1072_vm2, %v2344_v2, %v1069_v58 }
 0xdb5   :  { %v1084_v32 = vmul.f32 %v1073_v6, %v1050_v30 }
 0xdb7   :  { %v1089_v9 = vmul.f32 %v2287_v5, %v1084_v32 }
 0xdb9   :  { %v2845_v10 = vadd.f32 %v2288_v7, %v1089_v9 }
 0xdbb   :  { %2200 = vmatmul.msk.f32.vlgmr.msra.gmra.mxu1 %vm61_vm0, %v2845_v10 }
 0xe08   :  { %v1035_v11 = vpop.f32.mrf.mxu0 }
 0xe09   :  { %v1036_v12 = vadd.f32 %v2815_v18, %v1035_v11 }
 0xe0b   :  { %v1039_v35 = vadd.f32 %v1036_v12, %v939_v46 }
 0xe0d   :  { %v1045_v13 = vsel %vm61_vm0, %v1039_v35, 0.0 }
 0xe0e   :  { %1046 = vadd.xlane.f32.xlu1 %v1045_v13 }
 0xe38   :  { %v1136_v15 = vpop.f32.mrf.mxu1 }
 0xe39   :  { %v2854_v16 = vadd.f32 %v2289_v14, %v1136_v15 }
 0xe3b   :  { %1206 = vrot.lane.b32.xlu1 %v2854_v16, %s2427_s19  ;;  %1208 = vrot.lane.b32.xlu0 %v2854_v16, %s2422_s3 }
 0xe81   :  { %v1047_v17 = vpop.xlane.xlu1 %1046 }
 0xe82   :  { %v1049_v18 = vmul.f32 %v1047_v17, %v2529_v8 }
 0xe84   :  { %v1051_v19 = vsub.f32 %v1039_v35, %v1049_v18 }
 0xe86   :  { %v1053_v20 = vmul.f32 %v1051_v19, %v1051_v19 }
 0xe88   :  { %v1057_v21 = vsel %vm61_vm0, %v1053_v20, 0.0 }
 0xe89   :  { %1058 = vadd.xlane.f32.xlu2 %v1057_v21 }
 0xead   :  { %v1209_v22 = vpop.permute.xlu0 %1208  ;;  %v1207_v23 = vpop.permute.xlu1 %1206 }
 0xeae   :  { %2205 = vmatpush.xpose.msk.msrb.mxu3 %vm172_vm5, %v1209_v22  ;;  %v2196_v22 = vld [vmem:[%s3126_s7 + $0x28] sm:$0xff] }
 0xeb1   :  { %2206 = vmatmul.msk.f32.vlgmr.msrb.gmra.mxu3 %vm172_vm5, %v1207_v23  ;;  %v2195_v23 = vld [vmem:[%s3126_s7 + $0x20] sm:$0xff] }
 0xeb2   :  { %1312 = vmatpush.msra.mxu3 %v2195_v23 }
 0xefc   :  { %v1059_v24 = vpop.xlane.xlu2 %1058 }
 0xefd   :  { %v1061_v25 = vmul.f32 %v1059_v24, %v2529_v8 }
 0xeff   :  { %v1063_v28 = vadd.f32 1e-12, %v1061_v25 }
 0xf01   :  { %2345 = vrsqrt.f32 %v1063_v28  ;;  %vm1080_vm4 = vweird.f32 %v1063_v28 }
 0xf07   :  { %v2346_v29 = vpop.eup %2345 }
 0xf08   :  { %v1075_v31 = vmul.f32 %v2346_v29, %v1063_v28  ;;  %vm1081_vm3 = vweird.f32 %v2346_v29 }
 0xf09   :  { %vm1082_vm6 = vmor %vm1080_vm4, %vm1081_vm3  ;;  %vm2134_vm4 = vcmask 1040384  }
 0xf0a   :  { %v1076_v34 = vmul.f32 %v2346_v29, %v1075_v31 }
 0xf0c   :  { %v1077_v36 = vmul.f32 0.5, %v1076_v34 }
 0xf0e   :  { %v1078_v38 = vsub.f32 1.5, %v1077_v36 }
 0xf10   :  { %v1079_v40 = vmul.f32 %v2346_v29, %v1078_v38 }
 0xf12   :  { %v1083_v44 = vsel %vm1082_vm6, %v2346_v29, %v1079_v40 }
 0xf13   :  { %v1085_v45 = vmul.f32 %v1083_v44, %v1051_v19 }
 0xf15   :  { %v1090_v46 = vmul.f32 %v2287_v5, %v1085_v45 }
 0xf17   :  { %v2865_v47 = vadd.f32 %v2288_v7, %v1090_v46 }
 0xf19   :  { %2201 = vmatmul.msk.f32.gmra.mxu1 %vm61_vm0, %v2865_v47 }
 0xf34   :  { %v1231_v48 = vpop.f32.mrf.mxu3 }
 0xf35   :  { %v1232_v30 = vadd.f32 %v1231_v48, %v2586_v42 }
 0xf37   :  { %v1234_v49 = vsel %vm172_vm5, %v1232_v30, -inf }
 0xf38   :  { %1235 = vmax.xlane.f32.xlu0 %v1234_v49 }
 0xf4c   :  { %1406 = vrot.lane.b32.xlu0 %v2854_v16, %s2431_s22 }
 0xf96   :  { %v1139_v50 = vpop.f32.mrf.mxu1 }
 0xf97   :  { %v2873_v51 = vadd.f32 %v2289_v14, %v1139_v50 }
 0xf99   :  { %1496 = vrot.lane.b32.xlu2 %v2873_v51, %s2424_s27 }
 0xfa1   :  { %1143 = vrot.lane.b32.xlu2 %v2854_v16, %s2424_s27  ;;  %s3151_s27 = smov 64  }
 0xfa9   :  { %1245 = vrot.lane.b32.xlu2 %v2854_v16, %s2425_s30 }
 0xfab   :  { %v1236_v52 = vpop.xlane.xlu0 %1235 }
 0xfac   :  { %v1237_v33 = vsub.f32 %v1232_v30, %v1236_v52 }
 0xfae   :  { %v1238_v53 = vmul.f32 1.442695, %v1237_v33 }
 0xfb0   :  { %2347 = vpow2.f32 %v1238_v53 }
 0xfb1   :  { %1319 = vrot.lane.b32.xlu2 %v2854_v16, %s2426_s18 }
 0xfb6   :  { %v2348_v54 = vpop.eup %2347 }
 0xfb7   :  { %v1240_v55 = vsel %vm172_vm5, %v2348_v54, 0.0 }
 0xfb8   :  { %1241 = vadd.xlane.f32.xlu1 %v1240_v55 }
 0xfb9   :  { %1317 = vrot.lane.b32.xlu2 %v2854_v16, %s2428_s1 }
 0xfbe   :  { %v1407_v63 = vpop.permute.xlu0 %1406 }
 0xfc1   :  { %1408 = vrot.lane.b32.xlu2 %v2854_v16, %s3150_s6 }
 0xff3   :  { %v1497_v56 = vpop.permute.xlu2 %1496 }
 0xff4   :  { %2218 = vmatpush.xpose.msk.msra.mxu0 %vm172_vm5, %v1497_v56 }
 0xff7   :  { %2219 = vmatmul.msk.f32.vlgmr.msra.gmra.mxu0 %vm172_vm5, %v2873_v51 }
 0xff8   :  { %1642 = vmatpush.msrb.mxu0 %v2196_v22 }
 0xffb   :  { %v1144_v37 = vpop.permute.xlu2 %1143 }
 0xffc   :  { %2202 = vmatpush.xpose.msk.msrb.mxu1 %vm172_vm5, %v1144_v37 }
 0xfff   :  { %2203 = vmatmul.msk.f32.vlgmr.msrb.gmra.mxu1 %vm172_vm5, %v2854_v16 }
0x1003   :  { %v1246_v43 = vpop.permute.xlu2 %1245 }
0x1004   :  { %1266 = vmatpush.msra.mxu2 %v1246_v43 }
0x100b   :  { %v1320_v57 = vpop.permute.xlu2 %1319 }
0x100c   :  { %2210 = vmatpush.xpose.msk.msrb.mxu2 %vm172_vm5, %v1320_v57 }
0x1013   :  { %v1318_v26 = vpop.permute.xlu2 %1317 }
0x101b   :  { %v1409_v62 = vpop.permute.xlu2 %1408 }
0x102b   :  { %v1242_v60 = vpop.xlane.xlu1 %1241 }
0x102c   :  { %2349 = vrcp.f32 %v1242_v60 }
0x1032   :  { %v2350_v39 = vpop.eup %2349 }
0x1033   :  { %v1244_v61 = vmul.f32 %v2350_v39, %v2348_v54 }
0x1035   :  { %2207 = vmatmul.msk.f32.vlgmr.msra.gmra.mxu2 %vm172_vm5, %v1244_v61 }
0x1036   :  { %2214 = vmatpush.xpose.msk.msra.mxu2 %vm172_vm5, %v1409_v62 }
0x103d   :  { %2211 = vmatmul.msk.f32.vlgmr.msrb.gmra.mxu2 %vm172_vm5, %v1318_v26 }
0x1045   :  { %2215 = vmatmul.msk.f32.vlgmr.msra.gmra.mxu2 %vm172_vm5, %v1407_v63 }
0x1074   :  { %v1519_v0 = vpop.f32.mrf.mxu0 }
0x1075   :  { %v1520_v1 = vadd.f32 %v1519_v0, %v2657_v59  ;;  %v2197_v0 = vld [vmem:[%s3126_s7 + $0x30] sm:$0xff] }
0x1076   :  { %1400 = vmatpush.msrb.mxu3 %v2197_v0  ;;  %1753 = vmatpush.msra.mxu0 %v2197_v0 }
0x1077   :  { %v1522_v2 = vsel %vm172_vm5, %v1520_v1, -inf }
0x1078   :  { %1523 = vmax.xlane.f32.xlu2 %v1522_v2 }
0x107c   :  { %v1166_v41 = vpop.f32.mrf.mxu1 }
0x107d   :  { %v1167_v3 = vadd.f32 %v1166_v41, %v2586_v42 }
0x107f   :  { %v1169_v27 = vsel %vm172_vm5, %v1167_v3, -inf }
0x1080   :  { %1170 = vmax.xlane.f32.xlu0 %v1169_v27 }
0x1094   :  { %1180 = vrot.lane.b32.xlu0 %v2854_v16, %s3151_s27 }
0x109c   :  { %1445 = vrot.lane.b32.xlu0 %v2854_v16, %s3152_s25 }
0x10a4   :  { %1559 = vrot.lane.b32.xlu0 %v2873_v51, %s2427_s19 }
0x10ac   :  { %1761 = vrot.lane.b32.xlu0 %v2873_v51, %s3150_s6 }
0x10b4   :  { %1672 = vrot.lane.b32.xlu0 %v2873_v51, %s2426_s18 }
0x10b8   :  { %v1268_v4 = vpop.f32.mrf.mxu2 }
0x10c0   :  { %v1342_v58 = vpop.f32.mrf.mxu2 }
0x10c1   :  { %v1343_v20 = vadd.f32 %v1342_v58, %v2586_v42 }
0x10c3   :  { %v1345_v21 = vsel %vm172_vm5, %v1343_v20, -inf }
0x10c8   :  { %v1431_v5 = vpop.f32.mrf.mxu2 }
0x10c9   :  { %v1432_v6 = vadd.f32 %v1431_v5, %v2586_v42 }
0x10cb   :  { %v1434_v32 = vsel %vm172_vm5, %v1432_v6, -inf }
0x10cc   :  { %1435 = vmax.xlane.f32.xlu2 %v1434_v32 }
0x10eb   :  { %v1524_v7 = vpop.xlane.xlu2 %1523 }
0x10ec   :  { %v1525_v9 = vsub.f32 %v1520_v1, %v1524_v7  ;;  %v2956_v1 = vld [vmem:[%s3126_s7 + $0x38] sm:$0xff] }
0x10ee   :  { %v1526_v11 = vmul.f32 1.442695, %v1525_v9 }
0x10f0   :  { %2351 = vpow2.f32 %v1526_v11 }
0x10f3   :  { %v1171_v12 = vpop.xlane.xlu0 %1170 }
0x10f4   :  { %v1172_v35 = vsub.f32 %v1167_v3, %v1171_v12 }
0x10f6   :  { %v2352_v13 = vpop.eup %2351  ;;  %v1173_v14 = vmul.f32 1.442695, %v1172_v35 }
0x10f7   :  { %v1528_v15 = vsel %vm172_vm5, %v2352_v13, 0.0 }
0x10f8   :  { %2353 = vpow2.f32 %v1173_v14  ;;  %1529 = vadd.xlane.f32.xlu1 %v1528_v15 }
0x10fe   :  { %v2354_v17 = vpop.eup %2353 }
0x10ff   :  { %v1175_v18 = vsel %vm172_vm5, %v2354_v17, 0.0 }
0x1100   :  { %1176 = vadd.xlane.f32.xlu2 %v1175_v18 }
0x1106   :  { %v1181_v19 = vpop.permute.xlu0 %1180 }
0x1107   :  { %1201 = vmatpush.msra.mxu1 %v1181_v19 }
0x1109   :  { %1289 = vmatpush.msrb.mxu1 %v2196_v22  ;;  %v2974_v22 = vld [vmem:[%s3127_s8 + $0x1] ss:$0 sm:$0xff] }
0x110e   :  { %v1446_v24 = vpop.permute.xlu0 %1445 }
0x1111   :  { %1533 = vrot.lane.b32.xlu1 %v2873_v51, %s3151_s27 }
0x1116   :  { %v1560_v34 = vpop.permute.xlu0 %1559 }
0x111e   :  { %v1762_v44 = vpop.permute.xlu0 %1761 }
0x1126   :  { %v1673_v62 = vpop.permute.xlu0 %1672 }
0x113b   :  { %1346 = vmax.xlane.f32.xlu1 %v1345_v21 }
0x113f   :  { %v1436_v42 = vpop.xlane.xlu2 %1435 }
0x1140   :  { %v1437_v48 = vsub.f32 %v1432_v6, %v1436_v42 }
0x1142   :  { %v1438_v49 = vmul.f32 1.442695, %v1437_v48 }
0x1154   :  { %1561 = vrot.lane.b32.xlu1 %v2873_v51, %s2422_s3  ;;  %s3153_s3 = smov 48  }
0x115c   :  { %1670 = vrot.lane.b32.xlu1 %v2873_v51, %s2428_s1 }
0x116b   :  { %v1530_v28 = vpop.xlane.xlu1 %1529 }
0x1173   :  { %v1177_v25 = vpop.xlane.xlu2 %1176 }
0x1174   :  { %2355 = vrcp.f32 %v1177_v25 }
0x1175   :  { %2357 = vrcp.f32 %v1530_v28 }
0x117a   :  { %v2356_v29 = vpop.eup %2355 }
0x117b   :  { %v1179_v31 = vmul.f32 %v2356_v29, %v2354_v17  ;;  %v2358_v36 = vpop.eup %2357 }
0x117c   :  { %v1532_v38 = vmul.f32 %v2358_v36, %v2352_v13 }
0x117d   :  { %2204 = vmatmul.msk.f32.vlgmr.msra.gmra.mxu1 %vm172_vm5, %v1179_v31 }
0x1183   :  { %v1534_v40 = vpop.permute.xlu1 %1533 }
0x1184   :  { %1554 = vmatpush.msrb.mxu2 %v1534_v40 }
0x1185   :  { %2208 = vmatmul.msk.f32.vlgmr.msrb.gmra.mxu1 %vm172_vm5, %v1268_v4  ;;  %2220 = vmatmul.msk.f32.vlgmr.msrb.gmra.mxu2 %vm172_vm5, %v1532_v38 }
0x1186   :  { %1665 = vmatpush.msra.mxu2 %v2195_v23 }
0x1188   :  { %2230 = vmatpush.xpose.msk.msrb.mxu2 %vm172_vm5, %v1762_v44 }
0x11ae   :  { %v1347_v45 = vpop.xlane.xlu1 %1346 }
0x11af   :  { %v1348_v46 = vsub.f32 %v1343_v20, %v1347_v45 }
0x11b1   :  { %v1349_v30 = vmul.f32 1.442695, %v1348_v46 }
0x11b3   :  { %2359 = vpow2.f32 %v1349_v30 }
0x11b4   :  { %2361 = vpow2.f32 %v1438_v49 }
0x11b9   :  { %v2360_v50 = vpop.eup %2359 }
0x11ba   :  { %v1351_v52 = vsel %vm172_vm5, %v2360_v50, 0.0  ;;  %v2362_v33 = vpop.eup %2361 }
0x11bb   :  { %1352 = vadd.xlane.f32.xlu2 %v1351_v52  ;;  %v1440_v53 = vsel %vm172_vm5, %v2362_v33, 0.0 }
0x11c3   :  { %1441 = vadd.xlane.f32.xlu2 %v1440_v53 }
0x11db   :  { %1356 = vrot.lane.b32.xlu2 %v2854_v16, %s3153_s3  ;;  %v1562_v16 = vpop.permute.xlu1 %1561 }
0x11e3   :  { %1759 = vrot.lane.b32.xlu2 %v2873_v51, %s2431_s22  ;;  %v1671_v63 = vpop.permute.xlu1 %1670 }
0x11fa   :  { %v1203_v54 = vpop.f32.mrf.mxu1 }
0x11fb   :  { %2209 = vmatmul.msk.f32.vlgmr.msra.gmra.mxu3 %vm172_vm5, %v1203_v54 }
0x11fc   :  { %1489 = vmatpush.msra.mxu3 %v2956_v1 }
0x1202   :  { %v1291_v2 = vpop.f32.mrf.mxu1 }
0x1208   :  { %v1556_v55 = vpop.f32.mrf.mxu2 }
0x1209   :  { %2225 = vmatmul.msk.f32.vlgmr.msra.gmra.mxu2 %vm172_vm5, %v1556_v55 }
0x122e   :  { %v1353_v56 = vpop.xlane.xlu2 %1352 }
0x122f   :  { %2363 = vrcp.f32 %v1353_v56 }
0x1235   :  { %v2364_v43 = vpop.eup %2363 }
0x1236   :  { %v1442_v37 = vpop.xlane.xlu2 %1441  ;;  %v1355_v57 = vmul.f32 %v2364_v43, %v2360_v50 }
0x1237   :  { %2365 = vrcp.f32 %v1442_v37 }
0x123d   :  { %v2366_v60 = vpop.eup %2365 }
0x123e   :  { %v1357_v26 = vpop.permute.xlu2 %1356  ;;  %v1444_v39 = vmul.f32 %v2366_v60, %v2362_v33 }
0x123f   :  { %1377 = vmatpush.msra.mxu1 %v1357_v26 }
0x1240   :  { %2212 = vmatmul.msk.f32.vlgmr.msra.gmra.mxu1 %vm172_vm5, %v1355_v57 }
0x1241   :  { %1466 = vmatpush.msrb.mxu1 %v1446_v24 }
0x1243   :  { %2221 = vmatpush.xpose.msk.msra.mxu1 %vm172_vm5, %v1562_v16 }
0x1246   :  { %v1760_v61 = vpop.permute.xlu2 %1759 }
0x1247   :  { %2231 = vmatmul.msk.f32.vlgmr.msrb.gmra.mxu2 %vm172_vm5, %v1760_v61 }
0x1248   :  { %2216 = vmatmul.msk.f32.vlgmr.msrb.gmra.mxu1 %vm172_vm5, %v1444_v39 }
0x1249   :  { %2226 = vmatpush.xpose.msk.msrb.mxu1 %vm172_vm5, %v1673_v62 }
0x1250   :  { %2222 = vmatmul.msk.f32.vlgmr.msra.gmra.mxu1 %vm172_vm5, %v1560_v34 }
0x1258   :  { %2227 = vmatmul.msk.f32.vlgmr.msrb.gmra.mxu1 %vm172_vm5, %v1671_v63 }
0x127e   :  { %v1314_v35 = vpop.f32.mrf.mxu3 }
0x127f   :  { %v1315_v18 = vadd.f32 %v1314_v35, %v1291_v2  ;;  %v2239_v2 = vld [vmem:[%s3130_s11 + $0x38] sm:$0xff] }
0x128c   :  { %v2960_v3 = vpop.f32.mrf.mxu2 }
0x12bd   :  { %v1379_v41 = vpop.f32.mrf.mxu1 }
0x12be   :  { %2213 = vmatmul.msk.f32.vlgmr.msrb.gmra.mxu3 %vm172_vm5, %v1379_v41 }
0x12c5   :  { %v1468_v27 = vpop.f32.mrf.mxu1 }
0x12c6   :  { %2217 = vmatmul.msk.f32.vlgmr.msra.gmra.mxu3 %vm172_vm5, %v1468_v27  ;;  %v2238_v27 = vld [vmem:[%s3130_s11 + $0x30] sm:$0xff] }
0x12ca   :  { %v1784_v4 = vpop.f32.mrf.mxu2 }
0x12cb   :  { %v1785_v58 = vadd.f32 %v1784_v4, %v2657_v59 }
0x12cd   :  { %v1584_v5 = vpop.f32.mrf.mxu1  ;;  %v1787_v6 = vsel %vm172_vm5, %v1785_v58, -inf }
0x12ce   :  { %v1585_v32 = vadd.f32 %v1584_v5, %v2657_v59  ;;  %1788 = vmax.xlane.f32.xlu1 %v1787_v6  ;;  %v2236_v5 = vld [vmem:[%s3130_s11 + $0x20] sm:$0xff] }
0x12d0   :  { %v1587_v7 = vsel %vm172_vm5, %v1585_v32, -inf }
0x12d1   :  { %1588 = vmax.xlane.f32.xlu2 %v1587_v7 }
0x12d5   :  { %v1695_v9 = vpop.f32.mrf.mxu1 }
0x12d6   :  { %v1696_v11 = vadd.f32 %v1695_v9, %v2657_v59  ;;  %v3010_v9 = vld [vmem:[%s3128_s9 + $0x1] ss:$0 sm:$0xff] }
0x12d8   :  { %v1698_v12 = vsel %vm172_vm5, %v1696_v11, -inf }
0x12d9   :  { %1699 = vmax.xlane.f32.xlu0 %v1698_v12 }
0x12e7   :  { %1598 = vrot.lane.b32.xlu1 %v2873_v51, %s2425_s30 }
0x1341   :  { %v1402_v13 = vpop.f32.mrf.mxu3  ;;  %v1789_v14 = vpop.xlane.xlu1 %1788 }
0x1342   :  { %v1790_v19 = vsub.f32 %v1785_v58, %v1789_v14  ;;  %v1405_v21 = vadd.f32 %v1402_v13, %v1315_v18  ;;  %v2237_v58 = vld [vmem:[%s3130_s11 + $0x28] sm:$0xff]  ;;  %v3017_v13 = vld [vmem:[%s3129_s10 + $0x1] ss:$0 sm:$0xff] }
0x1343   :  { %v2256_v18 = vld [vmem:[%s3132_s13 + $0xe8] sm:$0xff] }
0x1344   :  { %v1589_v15 = vpop.xlane.xlu2 %1588  ;;  %v1791_v42 = vmul.f32 1.442695, %v1790_v19  ;;  %v2255_v19 = vld [vmem:[%s3132_s13 + $0xe0] sm:$0xff] }
0x1345   :  { %v1590_v17 = vsub.f32 %v1585_v32, %v1589_v15  ;;  %v2258_v15 = vld [vmem:[%s3132_s13 + $0xf8] sm:$0xff] }
0x1346   :  { %1992 = vmatpush.msra.mxu2 %v2258_v15 }
0x1347   :  { %v1591_v20 = vmul.f32 1.442695, %v1590_v17  ;;  %v2257_v17 = vld [vmem:[%s3132_s13 + $0xf0] sm:$0xff] }
0x1348   :  { %1993 = vmatpush.msra.mxu2 %v2257_v17 }
0x1349   :  { %2367 = vpow2.f32 %v1591_v20  ;;  %v1491_v59 = vpop.f32.mrf.mxu3  ;;  %v2254_v20 = vld [vmem:[%s3132_s13 + $0xd8] sm:$0xff] }
0x134a   :  { %v1494_v23 = vadd.f32 %v1491_v59, %v1405_v21  ;;  %2369 = vpow2.f32 %v1791_v42  ;;  %1994 = vmatpush.msra.mxu2 %v2256_v18  ;;  %v2253_v21 = vld [vmem:[%s3132_s13 + $0xd0] sm:$0xff]  ;;  %v2252_v59 = vld [vmem:[%s3132_s13 + $0xc8] sm:$0xff]  ;;  %v2250_v42 = vld [vmem:[%s3132_s13 + $0xb8] sm:$0xff] }
0x134c   :  { %v1851_v24 = vadd.f32 %v2974_v22, %v1494_v23  ;;  %v1700_v25 = vpop.xlane.xlu0 %1699  ;;  %1995 = vmatpush.msra.mxu2 %v2255_v19  ;;  %v2251_v23 = vld [vmem:[%s3132_s13 + $0xc0] sm:$0xff] }
0x134d   :  { %v1701_v28 = vsub.f32 %v1696_v11, %v1700_v25  ;;  %v2248_v25 = vld [vmem:[%s3132_s13 + $0xa8] sm:$0xff] }
0x134e   :  { %v1853_v29 = vadd.f32 %v1851_v24, %v2845_v10  ;;  %1996 = vmatpush.msra.mxu2 %v2254_v20  ;;  %v2249_v24 = vld [vmem:[%s3132_s13 + $0xb0] sm:$0xff] }
0x134f   :  { %v2368_v31 = vpop.eup %2367  ;;  %v1702_v34 = vmul.f32 1.442695, %v1701_v28  ;;  %v2247_v28 = vld [vmem:[%s3132_s13 + $0xa0] sm:$0xff] }
0x1350   :  { %v1859_v36 = vsel %vm61_vm0, %v1853_v29, 0.0  ;;  %v1593_v38 = vsel %vm172_vm5, %v2368_v31, 0.0  ;;  %v2370_v40 = vpop.eup %2369  ;;  %1997 = vmatpush.msra.mxu2 %v2253_v21 }
0x1351   :  { %2371 = vpow2.f32 %v1702_v34  ;;  %1860 = vadd.xlane.f32.xlu1 %v1859_v36  ;;  %1594 = vadd.xlane.f32.xlu2 %v1593_v38  ;;  %v1793_v46 = vsel %vm172_vm5, %v2370_v40, 0.0  ;;  %v2245_v34 = vld [vmem:[%s3132_s13 + $0x90] sm:$0xff]  ;;  %v2244_v36 = vld [vmem:[%s3132_s13 + $0x88] sm:$0xff]  ;;  %v2243_v38 = vld [vmem:[%s3132_s13 + $0x80] sm:$0xff] }
0x1352   :  { %1998 = vmatpush.msra.mxu2 %v2252_v59 }
0x1354   :  { %1999 = vmatpush.msra.mxu2 %v2251_v23 }
0x1356   :  { %2000 = vmatpush.msra.mxu2 %v2250_v42 }
0x1357   :  { %v2372_v44 = vpop.eup %2371 }
0x1358   :  { %v1704_v45 = vsel %vm172_vm5, %v2372_v44, 0.0  ;;  %2001 = vmatpush.msra.mxu2 %v2249_v24 }
0x1359   :  { %1705 = vadd.xlane.f32.xlu0 %v1704_v45  ;;  %v1599_v48 = vpop.permute.xlu1 %1598  ;;  %1794 = vadd.xlane.f32.xlu2 %v1793_v46 }
0x135a   :  { %1619 = vmatpush.msrb.mxu3 %v1599_v48  ;;  %2002 = vmatpush.msra.mxu2 %v2248_v25 }
0x135c   :  { %2003 = vmatpush.msra.mxu2 %v2247_v28 }
0x136d   :  { %1709 = vrot.lane.b32.xlu0 %v2873_v51, %s3153_s3 }
0x1371   :  { %1798 = vrot.lane.b32.xlu2 %v2873_v51, %s3152_s25 }
0x13c4   :  { %v1861_v10 = vpop.xlane.xlu1 %1860  ;;  %v1595_v30 = vpop.xlane.xlu2 %1594 }
0x13c5   :  { %v1865_v49 = vmul.f32 %v1861_v10, %v2529_v8  ;;  %2373 = vrcp.f32 %v1595_v30  ;;  %v2293_v10 = vld [vmem:[%s3131_s12 + $0x1] ss:$0 sm:$0xff] }
0x13c7   :  { %v1867_v50 = vsub.f32 %v1853_v29, %v1865_v49  ;;  %v2246_v29 = vld [vmem:[%s3132_s13 + $0x98] sm:$0xff] }
0x13c8   :  { %2004 = vmatpush.msra.mxu2 %v2246_v29 }
0x13c9   :  { %v1869_v52 = vmul.f32 %v1867_v50, %v1867_v50 }
0x13ca   :  { %2005 = vmatpush.msra.mxu2 %v2245_v34 }
0x13cb   :  { %v2374_v33 = vpop.eup %2373  ;;  %v1871_v53 = vsel %vm61_vm0, %v1869_v52, 0.0 }
0x13cc   :  { %v1597_v54 = vmul.f32 %v2374_v33, %v2368_v31  ;;  %1872 = vadd.xlane.f32.xlu2 %v1871_v53  ;;  %v1795_v55 = vpop.xlane.xlu2 %1794  ;;  %v1706_v56 = vpop.xlane.xlu0 %1705  ;;  %2006 = vmatpush.msra.mxu2 %v2244_v36 }
0x13cd   :  { %2375 = vrcp.f32 %v1795_v55 }
0x13ce   :  { %2223 = vmatmul.msk.f32.vlgmr.msrb.gmra.mxu3 %vm172_vm5, %v1597_v54  ;;  %2377 = vrcp.f32 %v1706_v56  ;;  %2007 = vmatpush.msra.mxu2 %v2243_v38 }
0x13d3   :  { %v2376_v37 = vpop.eup %2375 }
0x13d4   :  { %v1799_v43 = vpop.permute.xlu2 %1798  ;;  %v1797_v51 = vmul.f32 %v2376_v37, %v2370_v40  ;;  %v2378_v57 = vpop.eup %2377 }
0x13d5   :  { %1819 = vmatpush.msra.mxu1 %v1799_v43  ;;  %v1708_v26 = vmul.f32 %v2378_v57, %v2372_v44 }
0x13d6   :  { %2232 = vmatmul.msk.f32.vlgmr.msra.gmra.mxu1 %vm172_vm5, %v1797_v51 }
0x13df   :  { %v1710_v16 = vpop.permute.xlu0 %1709 }
0x13e0   :  { %1730 = vmatpush.msra.mxu3 %v1710_v16 }
0x13e1   :  { %2228 = vmatmul.msk.f32.vlgmr.msra.gmra.mxu3 %vm172_vm5, %v1708_v26 }
0x13e2   :  { %1842 = vmatpush.msrb.mxu3 %v2956_v1 }
0x143f   :  { %v1873_v60 = vpop.xlane.xlu2 %1872 }
0x1440   :  { %v1877_v39 = vmul.f32 %v1873_v60, %v2529_v8 }
0x1442   :  { %v1879_v61 = vadd.f32 1e-12, %v1877_v39  ;;  %v2294_v39 = vld [vmem:[%s3133_s14 + $0x1] ss:$0 sm:$0xff] }
0x1444   :  { %2379 = vrsqrt.f32 %v1879_v61  ;;  %vm1887_vm8 = vweird.f32 %v1879_v61 }
0x144a   :  { %v2380_v62 = vpop.eup %2379 }
0x144b   :  { %v1882_v63 = vmul.f32 %v2380_v62, %v1879_v61  ;;  %vm1888_vm7 = vweird.f32 %v2380_v62 }
0x144c   :  { %vm1889_vm9 = vmor %vm1887_vm8, %vm1888_vm7 }
0x144d   :  { %v1883_v0 = vmul.f32 %v2380_v62, %v1882_v63 }
0x144f   :  { %v1884_v1 = vmul.f32 0.5, %v1883_v0 }
0x1451   :  { %v1621_v41 = vpop.f32.mrf.mxu3  ;;  %v1885_v6 = vsub.f32 1.5, %v1884_v1 }
0x1452   :  { %2224 = vmatmul.msk.f32.vlgmr.msrb.gmra.mxu0 %vm172_vm5, %v1621_v41 }
0x1453   :  { %1941 = vmatpush.msrb.mxu0 %v2239_v2  ;;  %v1821_v4 = vpop.f32.mrf.mxu1  ;;  %v1886_v32 = vmul.f32 %v2380_v62, %v1885_v6 }
0x1454   :  { %2233 = vmatmul.msk.f32.vlgmr.msrb.gmra.mxu3 %vm172_vm5, %v1821_v4 }
0x1455   :  { %1942 = vmatpush.msrb.mxu0 %v2238_v27  ;;  %v1890_v7 = vsel %vm1889_vm9, %v2380_v62, %v1886_v32 }
0x1456   :  { %v1901_v11 = vmul.f32 %v1890_v7, %v1867_v50 }
0x1457   :  { %1943 = vmatpush.msrb.mxu0 %v2237_v58 }
0x1458   :  { %v1906_v35 = vmul.f32 %v3010_v9, %v1901_v11 }
0x1459   :  { %1944 = vmatpush.msrb.mxu0 %v2236_v5 }
0x145a   :  { %v3020_v14 = vadd.f32 %v3017_v13, %v1906_v35 }
0x1464   :  { %v1732_v12 = vpop.f32.mrf.mxu3 }
0x1465   :  { %2229 = vmatmul.msk.f32.vlgmr.msra.gmra.mxu0 %vm172_vm5, %v1732_v12 }
0x146d   :  { %2241 = vmatmul.msk.f32.vlgmr.msrb.gmra.mxu0 %vm61_vm0, %v3020_v14 }
0x14cf   :  { %v1644_v31 = vpop.f32.mrf.mxu0 }
0x14d0   :  { %v1668_v40 = vadd.f32 %v2960_v3, %v1644_v31  ;;  %v2433_v31 = vmov 0  }
0x14d1   :  { %2276 = vset.pattern.permute.xlu1 %v2433_v31  ;;  %2278 = vset.pattern.permute.xlu0 %v2433_v31 }
0x14d2   :  { %2277 = vset.pattern.permute.xlu2 %v2433_v31 }
0x14d7   :  { %v1844_v46 = vpop.f32.mrf.mxu3 }
0x14e2   :  { %v1755_v44 = vpop.f32.mrf.mxu0 }
0x14e3   :  { %v1758_v45 = vadd.f32 %v1755_v44, %v1668_v40  ;;  %v2075_v44 = vld [vmem:[%s3121_s2] sm:$0xff] }
0x14e5   :  { %v1847_v48 = vadd.f32 %v1844_v46, %v1758_v45  ;;  %v2097_v45 = vsel %vm2096_vm12, %v2075_v44, 0.0 }
0x14e6   :  { %v2098_v46 = vrot.slane %v2097_v45, 4 }
0x14e7   :  { %v1852_v30 = vadd.f32 %v2974_v22, %v1847_v48 }
0x14e8   :  { %v2099_v48 = vadd.f32 %v2098_v46, %v2097_v45 }
0x14e9   :  { %v1854_v49 = vadd.f32 %v1852_v30, %v2865_v47 }
0x14ea   :  { %v1946_v50 = vpop.f32.mrf.mxu0 }
0x14eb   :  { %v1947_v52 = vadd.f32 %v2293_v10, %v1946_v50  ;;  %v1862_v33 = vsel %vm61_vm0, %v1854_v49, 0.0 }
0x14ec   :  { %1863 = vadd.xlane.f32.xlu0 %v1862_v33 }
0x14ed   :  { %v1954_v53 = vmul.f32 0.044715, %v1947_v52  ;;  %v1952_v43 = vmul.f32 0.5, %v1947_v52 }
0x14ef   :  { %v1956_v3 = vmul.f32 %v1954_v53, %v1947_v52 }
0x14f1   :  { %v1958_v54 = vmul.f32 %v1956_v3, %v1947_v52 }
0x14f3   :  { %v1960_v55 = vadd.f32 %v1958_v54, %v1947_v52 }
0x14f5   :  { %v1962_v56 = vmul.f32 0.7978846, %v1960_v55 }
0x14f7   :  { %2381 = vtanh.f32 %v1962_v56 }
0x14fd   :  { %v2382_v37 = vpop.eup %2381 }
0x14fe   :  { %v1966_v51 = vadd.f32 1.0, %v2382_v37 }
0x1500   :  { %v1968_v57 = vmul.f32 %v1966_v51, %v1952_v43 }
0x1502   :  { %2008 = vmatmul.f32.vlgmr.msra.gmra.mxu2 %v1968_v57 }
0x155f   :  { %v1864_v26 = vpop.xlane.xlu0 %1863 }
0x1560   :  { %v1866_v22 = vmul.f32 %v1864_v26, %v2529_v8 }
0x1562   :  { %v1868_v47 = vsub.f32 %v1854_v49, %v1866_v22  ;;  %v2076_v49 = vld [vmem:[%s3121_s2 + $0x8] sm:$0xff] }
0x1563   :  { %v2119_v52 = vsel %vm2096_vm12, %v2076_v49, 0.0 }
0x1564   :  { %v1870_v16 = vmul.f32 %v1868_v47, %v1868_v47  ;;  %v2120_v33 = vrot.slane %v2119_v52, 4 }
0x1566   :  { %v1874_v60 = vsel %vm61_vm0, %v1870_v16, 0.0  ;;  %v2121_v54 = vadd.f32 %v2120_v33, %v2119_v52 }
0x1567   :  { %1875 = vadd.xlane.f32.xlu1 %v1874_v60 }
0x1568   :  { %v2122_v56 = vrot.slane %v2121_v54, 2 }
0x156a   :  { %v2123_v51 = vadd.f32 %v2122_v56, %v2121_v54 }
0x156c   :  { %v2124_v57 = vrot.slane %v2123_v51, 1 }
0x156e   :  { %v2125_v22 = vadd.f32 %v2124_v57, %v2123_v51 }
0x1585   :  { %v2009_v61 = vpop.f32.mrf.mxu2 }
0x1586   :  { %v2010_v62 = vadd.f32 %v2294_v39, %v2009_v61 }
0x1588   :  { %v2015_v63 = vadd.f32 %v2010_v62, %v3020_v14 }
0x158a   :  { %v2021_v0 = vsel %vm61_vm0, %v2015_v63, 0.0 }
0x158b   :  { %2022 = vadd.xlane.f32.xlu0 %v2021_v0 }
0x15da   :  { %v1876_v2 = vpop.xlane.xlu1 %1875 }
0x15db   :  { %v1878_v41 = vmul.f32 %v1876_v2, %v2529_v8 }
0x15dd   :  { %v1880_v27 = vadd.f32 1e-12, %v1878_v41 }
0x15df   :  { %2383 = vrsqrt.f32 %v1880_v27  ;;  %vm1897_vm10 = vweird.f32 %v1880_v27 }
0x15e5   :  { %v2384_v1 = vpop.eup %2383 }
0x15e6   :  { %v1892_v4 = vmul.f32 %v2384_v1, %v1880_v27  ;;  %vm1898_vm5 = vweird.f32 %v2384_v1 }
0x15e7   :  { %vm1899_vm11 = vmor %vm1897_vm10, %vm1898_vm5 }
0x15e8   :  { %v1893_v58 = vmul.f32 %v2384_v1, %v1892_v4 }
0x15ea   :  { %v1894_v5 = vmul.f32 0.5, %v1893_v58 }
0x15ec   :  { %v1895_v6 = vsub.f32 1.5, %v1894_v5 }
0x15ee   :  { %v1896_v32 = vmul.f32 %v2384_v1, %v1895_v6 }
0x15f0   :  { %v1900_v7 = vsel %vm1899_vm11, %v2384_v1, %v1896_v32 }
0x15f1   :  { %v1902_v11 = vmul.f32 %v1900_v7, %v1868_v47  ;;  %v2126_v47 = vmax.f32 %v2125_v22, 1e-09  ;;  %v2295_v7 = vld [vmem:[%s3134_s15 + $0x1] ss:$0 sm:$0xff]  ;;  %s2434_s15 = smov [#allocation2]  }
0x15f3   :  { %v1907_v12 = vmul.f32 %v3010_v9, %v1902_v11 }
0x15f5   :  { %v1912_v35 = vadd.f32 %v3017_v13, %v1907_v12  ;;  %v2296_v12 = vld [vmem:[%s3135_s16 + $0x1] ss:$0 sm:$0xff]  ;;  %s2143_s16 = sshll.u32 %s2434_s15, 4  ;;  %s2144_s16 = int_to_ptr.vmem [resolvable:$true] %s2143_s16 }
0x15f7   :  { %2242 = vmatmul.msk.f32.gmra.mxu0 %vm61_vm0, %v1912_v35 }
0x15fe   :  { %v2023_v14 = vpop.xlane.xlu0 %2022 }
0x15ff   :  { %v2027_v15 = vmul.f32 %v2023_v14, %v2529_v8 }
0x1601   :  { %v3091_v17 = vsub.f32 %v2015_v63, %v2027_v15 }
0x1603   :  { %v2031_v18 = vmul.f32 %v3091_v17, %v3091_v17 }
0x1605   :  { %v2033_v19 = vsel %vm61_vm0, %v2031_v18, 0.0 }
0x1606   :  { %2034 = vadd.xlane.f32.xlu2 %v2033_v19 }
0x161e   :  { %2084 = vperm.xlu2 %2277, %v2076_v49  }
0x1674   :  { %v1949_v20 = vpop.f32.mrf.mxu0 }
0x1675   :  { %v1950_v21 = vadd.f32 %v2293_v10, %v1949_v20  ;;  %v2100_v10 = vrot.slane %v2099_v48, 2 }
0x1677   :  { %v1955_v59 = vmul.f32 0.044715, %v1950_v21  ;;  %v1953_v25 = vmul.f32 0.5, %v1950_v21  ;;  %v2101_v53 = vadd.f32 %v2100_v10, %v2099_v48 }
0x1679   :  { %v1957_v23 = vmul.f32 %v1955_v59, %v1950_v21  ;;  %v2102_v37 = vrot.slane %v2101_v53, 1  ;;  %v2035_v61 = vpop.xlane.xlu2 %2034 }
0x167a   :  { %v2039_v62 = vmul.f32 %v2035_v61, %v2529_v8 }
0x167b   :  { %v1959_v9 = vmul.f32 %v1957_v23, %v1950_v21  ;;  %v2103_v26 = vadd.f32 %v2102_v37, %v2101_v53 }
0x167c   :  { %v2041_v63 = vadd.f32 1e-12, %v2039_v62 }
0x167d   :  { %v1961_v42 = vadd.f32 %v1959_v9, %v1950_v21  ;;  %v2104_v16 = vmax.f32 %v2103_v26, 1e-09 }
0x167e   :  { %vm2049_vm14 = vweird.f32 %v2041_v63 }
0x167f   :  { %v1963_v13 = vmul.f32 0.7978846, %v1961_v42 }
0x1681   :  { %2385 = vtanh.f32 %v1963_v13 }
0x1682   :  { %2387 = vrcp.f32 %v2126_v47 }
0x1683   :  { %2389 = vrcp.f32 %v2104_v16 }
0x1684   :  { %2391 = vrsqrt.f32 %v2041_v63 }
0x1687   :  { %v2386_v24 = vpop.eup %2385 }
0x1688   :  { %v1967_v28 = vadd.f32 1.0, %v2386_v24  ;;  %v2388_v60 = vpop.eup %2387 }
0x1689   :  { %2130 = vperm.xlu2 %2277, %v2388_v60  }
0x168a   :  { %v1969_v29 = vmul.f32 %v1967_v28, %v1953_v25 }
0x168c   :  { %2011 = vmatmul.f32.gmra.mxu2 %v1969_v29  ;;  %v2085_v29 = vpop.permute.xlu2 %2084 }
0x16e3   :  { %v2131_v52 = vpop.permute.xlu2 %2130 }
0x170f   :  { %v2012_v34 = vpop.f32.mrf.mxu2 }
0x1710   :  { %v2013_v36 = vadd.f32 %v2294_v39, %v2012_v34  ;;  %v2390_v39 = vpop.eup %2389 }
0x1711   :  { %v2392_v0 = vpop.eup %2391 }
0x1712   :  { %v2016_v38 = vadd.f32 %v2013_v36, %v1912_v35  ;;  %v2044_v2 = vmul.f32 %v2392_v0, %v2041_v63  ;;  %vm2050_vm13 = vweird.f32 %v2392_v0 }
0x1713   :  { %vm2051_vm15 = vmor %vm2049_vm14, %vm2050_vm13 }
0x1714   :  { %v2024_v40 = vsel %vm61_vm0, %v2016_v38, 0.0  ;;  %v2045_v41 = vmul.f32 %v2392_v0, %v2044_v2 }
0x1715   :  { %2025 = vadd.xlane.f32.xlu1 %v2024_v40 }
0x1716   :  { %v2046_v27 = vmul.f32 0.5, %v2045_v41 }
0x1718   :  { %v2047_v1 = vsub.f32 1.5, %v2046_v27 }
0x171a   :  { %v2048_v4 = vmul.f32 %v2392_v0, %v2047_v1 }
0x171c   :  { %v2052_v6 = vsel %vm2051_vm15, %v2392_v0, %v2048_v4 }
0x171d   :  { %v2063_v11 = vmul.f32 %v2052_v6, %v3091_v17 }
0x171f   :  { %v2068_v35 = vmul.f32 %v2295_v7, %v2063_v11 }
0x1721   :  { %v2073_v19 = vadd.f32 %v2296_v12, %v2068_v35 }
0x172e   :  { %2079 = vperm.xlu1 %2276, %v2075_v44  }
0x1788   :  { %v2026_v30 = vpop.xlane.xlu1 %2025 }
0x1789   :  { %v2028_v50 = vmul.f32 %v2026_v30, %v2529_v8 }
0x178b   :  { %v2030_v3 = vsub.f32 %v2016_v38, %v2028_v50 }
0x178d   :  { %v2032_v55 = vmul.f32 %v2030_v3, %v2030_v3 }
0x178f   :  { %v2036_v43 = vsel %vm61_vm0, %v2032_v55, 0.0 }
0x1790   :  { %2037 = vadd.xlane.f32.xlu0 %v2036_v43 }
0x17a0   :  { %v2080_v15 = vpop.permute.xlu1 %2079 }
0x17a4   :  { %2108 = vperm.xlu0 %2278, %v2390_v39  }
0x1803   :  { %v2038_v58 = vpop.xlane.xlu0 %2037 }
0x1804   :  { %v2040_v5 = vmul.f32 %v2038_v58, %v2529_v8  ;;  %v2087_v8 = vmul.f32 %v2080_v15, %v2073_v19 }
0x1806   :  { %v2042_v32 = vadd.f32 1e-12, %v2040_v5  ;;  %v2089_v23 = vsel %vm61_vm0, %v2087_v8, 0.0 }
0x1807   :  { %v2090_v17 = vrot.slane %v2089_v23, 4 }
0x1808   :  { %2393 = vrsqrt.f32 %v2042_v32  ;;  %vm2059_vm2 = vweird.f32 %v2042_v32 }
0x1809   :  { %v2091_v25 = vadd.f32 %v2090_v17, %v2089_v23 }
0x180b   :  { %v2092_v34 = vrot.slane %v2091_v25, 2 }
0x180d   :  { %v2093_v40 = vadd.f32 %v2092_v34, %v2091_v25 }
0x180e   :  { %v2394_v14 = vpop.eup %2393 }
0x180f   :  { %v2054_v18 = vmul.f32 %v2394_v14, %v2042_v32  ;;  %vm2060_vm1 = vweird.f32 %v2394_v14  ;;  %v2094_v46 = vrot.slane %v2093_v40, 1 }
0x1810   :  { %vm2061_vm3 = vmor %vm2059_vm2, %vm2060_vm1 }
0x1811   :  { %v2055_v20 = vmul.f32 %v2394_v14, %v2054_v18  ;;  %v2095_v49 = vadd.f32 %v2094_v46, %v2093_v40 }
0x1813   :  { %v2056_v21 = vmul.f32 0.5, %v2055_v20 }
0x1815   :  { %v2057_v59 = vsub.f32 1.5, %v2056_v21 }
0x1816   :  { %v2109_v30 = vpop.permute.xlu0 %2108 }
0x1817   :  { %v2058_v9 = vmul.f32 %v2394_v14, %v2057_v59  ;;  %v2111_v33 = vmul.f32 %v2109_v30, %v2095_v49 }
0x1819   :  { %v2062_v42 = vsel %vm2061_vm3, %v2394_v14, %v2058_v9 }
0x181a   :  { %v2064_v13 = vmul.f32 %v2062_v42, %v2030_v3 }
0x181c   :  { %v2069_v24 = vmul.f32 %v2295_v7, %v2064_v13 }
0x181e   :  { %v2074_v28 = vadd.f32 %v2296_v12, %v2069_v24 }
0x1820   :  { %v2088_v31 = vmul.f32 %v2085_v29, %v2074_v28 }
0x1822   :  { %v2112_v36 = vsel %vm61_vm0, %v2088_v31, 0.0  ;;  %vm2136_vm0 = vcmask 254976  }
0x1823   :  { %v2113_v38 = vrot.slane %v2112_v36, 4 }
0x1825   :  { %v2114_v44 = vadd.f32 %v2113_v38, %v2112_v36 }
0x1827   :  { %v2115_v45 = vrot.slane %v2114_v44, 2 }
0x1829   :  { %v2116_v48 = vadd.f32 %v2115_v45, %v2114_v44 }
0x182b   :  { %v2117_v10 = vrot.slane %v2116_v48, 1 }
0x182d   :  { %v2118_v50 = vadd.f32 %v2117_v10, %v2116_v48 }
0x182f   :  { %v2133_v53 = vmul.f32 %v2131_v52, %v2118_v50 }
0x1831   :  { %v2135_v3 = vsel %vm2134_vm4, %v2111_v33, %v2133_v53 }
0x1832   :  { %2137 = vst.msk [vmem:[#allocation2] sm:$0x3] %vm2136_vm0, %v2135_v3 }
0x1833   :  { %2148 = dma.vmem_to_hbm [thread:$0]  %s2144_s16, 32, %s2146_s26, [#allocation3]  }
0x1834   :  { %2419 = dma.done.wait [#allocation3], 32  }
0x1835   :  { %2420 = vsyncadd [#allocation3], 4294967264 }
0x1836   :  { %2153 = vsyncpa [#allocation3], 1 }

</bundles_post_ra>
